<compile_context>
chip_gen: v5e
topology: v5e:2x2
jax: 0.10.0
libtpu: 0.0.40
codegen_flags: <defaults>
</compile_context>

<pallas_src>
import numpy as np
import jax
import jax.numpy as jnp
from jax import lax
from jax.experimental import pallas as pl
from jax.experimental.pallas import tpu as pltpu

NEG_SLOPE = 0.01       # nn.LeakyReLU() default
KERNEL_SIZE = 5
STRIDE = 2
PADDING = 0
LANE = 128
SUBLANE = 8


def _l_out(l_in):
    return (l_in + 2 * PADDING - (KERNEL_SIZE - 1) - 1) // STRIDE + 1


def _round_up(n, m):
    return ((n + m - 1) // m) * m


def _leaky(x):
    # Valid because NEG_SLOPE < 1: max(x, a*x) == leaky_relu(x).
    return jnp.maximum(x, NEG_SLOPE * x)


# --------------------------------------------------------------------------- #
# Kernel: whole network as 5 chained MXU matmuls on a (TB, features) batch tile.
# All feature widths are 128-lane multiples; weights/biases are VMEM-resident
# across the batch grid (constant index_map).
# --------------------------------------------------------------------------- #
def _lenet1d_kernel(x_ref, w1_ref, b1_ref, w2_ref, b2_ref, w3_ref, b3_ref,
                    w4_ref, b4_ref, w5_ref, b5_ref, out_ref):
    mm_dt = w1_ref.dtype                                              # bf16 (or f32)
    h = x_ref[...].astype(mm_dt)                                      # (TB, K0p)
    h = _leaky(jnp.dot(h, w1_ref[...],
                       preferred_element_type=jnp.float32) + b1_ref[...])   # (TB, 256)
    h = _leaky(jnp.dot(h.astype(mm_dt), w2_ref[...],
                       preferred_element_type=jnp.float32) + b2_ref[...])   # (TB, 256)
    h = _leaky(jnp.dot(h.astype(mm_dt), w3_ref[...],
                       preferred_element_type=jnp.float32) + b3_ref[...])   # (TB, 640)
    h = _leaky(jnp.dot(h.astype(mm_dt), w4_ref[...],
                       preferred_element_type=jnp.float32) + b4_ref[...])   # (TB, 128)
    out_ref[...] = (jnp.dot(h.astype(mm_dt), w5_ref[...],
                            preferred_element_type=jnp.float32) + b5_ref[...])


# --------------------------------------------------------------------------- #
# One-time, host-side weight preprocessing (model-load time; NOT in hot path).
# --------------------------------------------------------------------------- #
def _conv_as_dense_np(w, l_in, l_out):
    """Fold a stride-2 valid Conv1d into a dense (L_in*C_in, L_out*C_out) matrix.

    Activations are channels-last flattened: flat index = l * C + c.
    w: torch layout (C_out, C_in, K).
    """
    c_out, c_in, k = w.shape
    w_kic = np.transpose(np.asarray(w, np.float32), (2, 1, 0))        # (K, C_in, C_out)
    dense = np.zeros((l_in, c_in, l_out, c_out), np.float32)
    for t in range(l_out):
        dense[STRIDE * t:STRIDE * t + k, :, t, :] = w_kic
    return dense.reshape(l_in * c_in, l_out * c_out)


def _pad2(m, rows, cols):
    out = np.zeros((rows, cols), np.float32)
    out[:m.shape[0], :m.shape[1]] = m
    return out


def _pad_bias(b, cols):
    out = np.zeros((1, cols), np.float32)
    out[0, :b.shape[0]] = b
    return out


def prepare_params(params, in_channel, input_len, output_len, *,
                   mm_dtype=jnp.bfloat16):
    """Build lane-dense (128-padded) dense weight matrices once at model load."""
    (w1, b1, w2, b2, w3, b3, fw1, fb1, fw2, fb2) = params
    l1 = _l_out(input_len)
    l2 = _l_out(l1)
    l3 = _l_out(l2)
    assert l3 >= 1, "input_len too small for three stride-2, k=5 convs"

    k0, n1, n2, n3 = input_len * in_channel, l1 * 6, l2 * 16, l3 * 120
    n4, n5 = fw1.shape[0], output_len
    k0p, n1p, n2p = _round_up(k0, LANE), _round_up(n1, LANE), _round_up(n2, LANE)
    n3p, n4p, n5p = _round_up(n3, LANE), _round_up(n4, LANE), _round_up(n5, LANE)

    # Conv layers -> block-Toeplitz dense matrices, zero-padded to 128 lanes.
    w1d = _pad2(_conv_as_dense_np(w1, input_len, l1), k0p, n1p)
    w2d = _pad2(_conv_as_dense_np(w2, l1, l2), n1p, n2p)
    w3d = _pad2(_conv_as_dense_np(w3, l2, l3), n2p, n3p)

    # fc1: torch flattens (B, 120, l3) as c*l3 + t; our activations are t*120 + c.
    fw1p = np.asarray(fw1, np.float32).reshape(n4, 120, l3).transpose(2, 1, 0)
    w4d = _pad2(fw1p.reshape(n3, n4), n3p, n4p)
    # fc2: zero-pad output lanes to a 128 multiple; sliced off in the wrapper.
    w5d = _pad2(np.asarray(fw2, np.float32).T, n4p, n5p)

    b1d = _pad_bias(np.tile(np.asarray(b1, np.float32), l1), n1p)
    b2d = _pad_bias(np.tile(np.asarray(b2, np.float32), l2), n2p)
    b3d = _pad_bias(np.tile(np.asarray(b3, np.float32), l3), n3p)
    b4d = _pad_bias(np.asarray(fb1, np.float32), n4p)
    b5d = _pad_bias(np.asarray(fb2, np.float32), n5p)

    weights = (jnp.asarray(w1d, mm_dtype), jnp.asarray(b1d, jnp.float32),
               jnp.asarray(w2d, mm_dtype), jnp.asarray(b2d, jnp.float32),
               jnp.asarray(w3d, mm_dtype), jnp.asarray(b3d, jnp.float32),
               jnp.asarray(w4d, mm_dtype), jnp.asarray(b4d, jnp.float32),
               jnp.asarray(w5d, mm_dtype), jnp.asarray(b5d, jnp.float32))
    return {"weights": weights, "out_len": output_len, "in_feat": k0,
            "in_feat_pad": k0p, "out_pad": n5p}


# --------------------------------------------------------------------------- #
# Jitted forward over pre-processed weights.
# --------------------------------------------------------------------------- #
def make_forward(prepared, *, batch_tile=256, vmem_limit_bytes=32 * 1024 * 1024):
    """batch_tile=256 keeps double-buffered x/out tiles plus ~0.8 MiB of
    resident bf16 weights well under scoped VMEM on v5e/v6e/v7x (v7x has only
    64 MiB physical VMEM)."""
    weights = prepared["weights"]
    out_len = prepared["out_len"]
    in_feat = prepared["in_feat"]
    in_feat_pad = prepared["in_feat_pad"]
    out_pad = prepared["out_pad"]

    @jax.jit
    def fwd(x_ncl, *ws):
        b, c, l = x_ncl.shape
        assert c * l == in_feat, "input shape inconsistent with prepared params"
        # channels-last flatten: flat index = l * C_in + c (matches Toeplitz rows).
        x_flat = jnp.transpose(x_ncl, (0, 2, 1)).reshape(b, in_feat)
        x_flat = x_flat.astype(jnp.float32)
        if in_feat_pad != in_feat:
            x_flat = jnp.pad(x_flat, ((0, 0), (0, in_feat_pad - in_feat)))

        tb = min(batch_tile, _round_up(b, SUBLANE))        # sublane-aligned tile
        b_pad = _round_up(b, tb)
        if b_pad != b:
            x_flat = jnp.pad(x_flat, ((0, b_pad - b), (0, 0)))

        weight_specs = [pl.BlockSpec(w.shape, lambda i: (0, 0)) for w in ws]
        out = pl.pallas_call(
            _lenet1d_kernel,
            out_shape=jax.ShapeDtypeStruct((b_pad, out_pad), jnp.float32),
            grid=(b_pad // tb,),
            in_specs=[pl.BlockSpec((tb, in_feat_pad), lambda i: (i, 0))] + weight_specs,
            out_specs=pl.BlockSpec((tb, out_pad), lambda i: (i, 0)),
            compiler_params=pltpu.CompilerParams(
                dimension_semantics=("parallel",),
                vmem_limit_bytes=vmem_limit_bytes),
        )(x_flat, *ws)
        return out[:b, :out_len]

    return lambda x_ncl: fwd(x_ncl, *weights)


# --------------------------------------------------------------------------- #
# Pure-JAX reference with PyTorch (NCL) semantics.
# --------------------------------------------------------------------------- #
def lenet1d_reference(x_ncl, params):
    (w1, b1, w2, b2, w3, b3, fw1, fb1, fw2, fb2) = params

    def conv(x, w, b):
        y = lax.conv_general_dilated(
            x, w, window_strides=(STRIDE,), padding='VALID',
            dimension_numbers=('NCH', 'OIH', 'NCH'))
        return y + b[None, :, None]

    h = x_ncl
    for (w, b) in ((w1, b1), (w2, b2), (w3, b3)):
        h = _leaky(conv(h, w, b))
    flat = h.reshape(h.shape[0], -1)                  # (B, 120 * L3), torch order
    y = _leaky(flat @ fw1.T + fb1)
    return y @ fw2.T + fb2


if __name__ == "__main__":
    batch, in_channel, input_len, output_len = 2, 4, 64, 10
    l3 = _l_out(_l_out(_l_out(input_len)))            # = 5 -> fc1 in-features 600

    key = jax.random.PRNGKey(0)
    ks = jax.random.split(key, 6)

    def kaiming_out(k, shape):                        # Conv1d: fan_out = C_out * K
        std = (2.0 / (shape[0] * shape[2])) ** 0.5
        return std * jax.random.normal(k, shape, jnp.float32)

    w1 = kaiming_out(ks[0], (6, in_channel, KERNEL_SIZE))
    w2 = kaiming_out(ks[1], (16, 6, KERNEL_SIZE))
    w3 = kaiming_out(ks[2], (120, 16, KERNEL_SIZE))
    b1 = 0.01 * jnp.arange(6, dtype=jnp.float32)
    b2 = 0.01 * jnp.arange(16, dtype=jnp.float32)
    b3 = 0.01 * jnp.arange(120, dtype=jnp.float32)
    fw1 = 0.01 * jax.random.normal(ks[3], (84, 120 * l3), jnp.float32)
    fb1 = 0.01 * jnp.arange(84, dtype=jnp.float32)
    fw2 = 0.01 * jax.random.normal(ks[4], (output_len, 84), jnp.float32)
    fb2 = 0.01 * jnp.arange(output_len, dtype=jnp.float32)
    params = (w1, b1, w2, b2, w3, b3, fw1, fb1, fw2, fb2)

    x = jax.random.normal(ks[5], (batch, in_channel, input_len), jnp.float32)

    ref = jax.block_until_ready(lenet1d_reference(x, params))

    # f32 weight path: validates the Toeplitz / fc1-permute / padding layout exactly.
    fwd_f32 = make_forward(prepare_params(params, in_channel, input_len,
                                          output_len, mm_dtype=jnp.float32))
    out_f32 = jax.block_until_ready(fwd_f32(x))
    assert out_f32.shape == (batch, output_len)
    assert jnp.allclose(out_f32, ref, rtol=1e-4, atol=1e-4)

    # bf16 weight path (production default): looser tolerance for chained bf16 dots.
    fwd_bf16 = make_forward(prepare_params(params, in_channel, input_len,
                                           output_len, mm_dtype=jnp.bfloat16))
    out_bf16 = jax.block_until_ready(fwd_bf16(x))
    assert out_bf16.shape == (batch, output_len)
    assert jnp.allclose(out_bf16, ref, rtol=2e-2, atol=1e-2)

    print("KERNEL_OK")
</pallas_src>

<mosaic_0001>
module attributes {stable_mosaic.version = 11 : i64} {
  func.func @_lenet1d_kernel(%arg0: i32, %arg1: memref<8x256xf32, #tpu.memory_space<vmem>>, %arg2: memref<256x256xf32, #tpu.memory_space<vmem>>, %arg3: memref<1x256xf32, #tpu.memory_space<vmem>>, %arg4: memref<256x256xf32, #tpu.memory_space<vmem>>, %arg5: memref<1x256xf32, #tpu.memory_space<vmem>>, %arg6: memref<256x640xf32, #tpu.memory_space<vmem>>, %arg7: memref<1x640xf32, #tpu.memory_space<vmem>>, %arg8: memref<640x128xf32, #tpu.memory_space<vmem>>, %arg9: memref<1x128xf32, #tpu.memory_space<vmem>>, %arg10: memref<128x128xf32, #tpu.memory_space<vmem>>, %arg11: memref<1x128xf32, #tpu.memory_space<vmem>>, %arg12: memref<8x128xf32, #tpu.memory_space<vmem>>) attributes {dimension_semantics = [#tpu.dimension_semantics<parallel>], iteration_bounds = array<i64: 1>, scalar_prefetch = 0 : i64, scratch_operands = 0 : i64, tpu.core_type = #tpu.core_type<tc>, window_params = [{transform_indices = @transform_0, window_bounds = array<i64: 8, 256>}, {pipeline_mode = #tpu.pipeline_mode<synchronous>, transform_indices = @transform_1, window_bounds = array<i64: 256, 256>}, {pipeline_mode = #tpu.pipeline_mode<synchronous>, transform_indices = @transform_2, window_bounds = array<i64: 1, 256>}, {pipeline_mode = #tpu.pipeline_mode<synchronous>, transform_indices = @transform_3, window_bounds = array<i64: 256, 256>}, {pipeline_mode = #tpu.pipeline_mode<synchronous>, transform_indices = @transform_4, window_bounds = array<i64: 1, 256>}, {pipeline_mode = #tpu.pipeline_mode<synchronous>, transform_indices = @transform_5, window_bounds = array<i64: 256, 640>}, {pipeline_mode = #tpu.pipeline_mode<synchronous>, transform_indices = @transform_6, window_bounds = array<i64: 1, 640>}, {pipeline_mode = #tpu.pipeline_mode<synchronous>, transform_indices = @transform_7, window_bounds = array<i64: 640, 128>}, {pipeline_mode = #tpu.pipeline_mode<synchronous>, transform_indices = @transform_8, window_bounds = array<i64: 1, 128>}, {pipeline_mode = #tpu.pipeline_mode<synchronous>, transform_indices = @transform_9, window_bounds = array<i64: 128, 128>}, {pipeline_mode = #tpu.pipeline_mode<synchronous>, transform_indices = @transform_10, window_bounds = array<i64: 1, 128>}, {transform_indices = @transform_11, window_bounds = array<i64: 8, 128>}]} {
    %c0 = arith.constant 0 : index
    %c0_0 = arith.constant 0 : index
    %0 = vector.load %arg1[%c0, %c0_0] : memref<8x256xf32, #tpu.memory_space<vmem>>, vector<8x256xf32>
    %c0_1 = arith.constant 0 : index
    %c0_2 = arith.constant 0 : index
    %1 = vector.load %arg2[%c0_1, %c0_2] : memref<256x256xf32, #tpu.memory_space<vmem>>, vector<256x256xf32>
    %cst = arith.constant dense<0.000000e+00> : vector<8x256xf32>
    %2 = tpu.matmul %0, %1, %cst {dimension_numbers = #tpu.dot_dimension_numbers<[1], [0], [0], [1], [0, 0, 1, 1], [], []>} : vector<8x256xf32>, vector<256x256xf32>, vector<8x256xf32> -> vector<8x256xf32>
    %c0_3 = arith.constant 0 : index
    %c0_4 = arith.constant 0 : index
    %3 = vector.load %arg3[%c0_3, %c0_4] : memref<1x256xf32, #tpu.memory_space<vmem>>, vector<1x256xf32>
    %4 = vector.broadcast %3 : vector<1x256xf32> to vector<8x256xf32>
    %5 = arith.addf %2, %4 : vector<8x256xf32>
    %cst_5 = arith.constant 0.00999999977 : f32
    %6 = vector.broadcast %cst_5 : f32 to vector<8x256xf32>
    %7 = arith.mulf %6, %5 : vector<8x256xf32>
    %8 = arith.maximumf %5, %7 : vector<8x256xf32>
    %c0_6 = arith.constant 0 : index
    %c0_7 = arith.constant 0 : index
    %9 = vector.load %arg4[%c0_6, %c0_7] : memref<256x256xf32, #tpu.memory_space<vmem>>, vector<256x256xf32>
    %cst_8 = arith.constant dense<0.000000e+00> : vector<8x256xf32>
    %10 = tpu.matmul %8, %9, %cst_8 {dimension_numbers = #tpu.dot_dimension_numbers<[1], [0], [0], [1], [0, 0, 1, 1], [], []>} : vector<8x256xf32>, vector<256x256xf32>, vector<8x256xf32> -> vector<8x256xf32>
    %c0_9 = arith.constant 0 : index
    %c0_10 = arith.constant 0 : index
    %11 = vector.load %arg5[%c0_9, %c0_10] : memref<1x256xf32, #tpu.memory_space<vmem>>, vector<1x256xf32>
    %12 = vector.broadcast %11 : vector<1x256xf32> to vector<8x256xf32>
    %13 = arith.addf %10, %12 : vector<8x256xf32>
    %cst_11 = arith.constant 0.00999999977 : f32
    %14 = vector.broadcast %cst_11 : f32 to vector<8x256xf32>
    %15 = arith.mulf %14, %13 : vector<8x256xf32>
    %16 = arith.maximumf %13, %15 : vector<8x256xf32>
    %c0_12 = arith.constant 0 : index
    %c0_13 = arith.constant 0 : index
    %17 = vector.load %arg6[%c0_12, %c0_13] : memref<256x640xf32, #tpu.memory_space<vmem>>, vector<256x640xf32>
    %cst_14 = arith.constant dense<0.000000e+00> : vector<8x640xf32>
    %18 = tpu.matmul %16, %17, %cst_14 {dimension_numbers = #tpu.dot_dimension_numbers<[1], [0], [0], [1], [0, 0, 1, 1], [], []>} : vector<8x256xf32>, vector<256x640xf32>, vector<8x640xf32> -> vector<8x640xf32>
    %c0_15 = arith.constant 0 : index
    %c0_16 = arith.constant 0 : index
    %19 = vector.load %arg7[%c0_15, %c0_16] : memref<1x640xf32, #tpu.memory_space<vmem>>, vector<1x640xf32>
    %20 = vector.broadcast %19 : vector<1x640xf32> to vector<8x640xf32>
    %21 = arith.addf %18, %20 : vector<8x640xf32>
    %cst_17 = arith.constant 0.00999999977 : f32
    %22 = vector.broadcast %cst_17 : f32 to vector<8x640xf32>
    %23 = arith.mulf %22, %21 : vector<8x640xf32>
    %24 = arith.maximumf %21, %23 : vector<8x640xf32>
    %c0_18 = arith.constant 0 : index
    %c0_19 = arith.constant 0 : index
    %25 = vector.load %arg8[%c0_18, %c0_19] : memref<640x128xf32, #tpu.memory_space<vmem>>, vector<640x128xf32>
    %cst_20 = arith.constant dense<0.000000e+00> : vector<8x128xf32>
    %26 = tpu.matmul %24, %25, %cst_20 {dimension_numbers = #tpu.dot_dimension_numbers<[1], [0], [0], [1], [0, 0, 1, 1], [], []>} : vector<8x640xf32>, vector<640x128xf32>, vector<8x128xf32> -> vector<8x128xf32>
    %c0_21 = arith.constant 0 : index
    %c0_22 = arith.constant 0 : index
    %27 = vector.load %arg9[%c0_21, %c0_22] : memref<1x128xf32, #tpu.memory_space<vmem>>, vector<1x128xf32>
    %28 = vector.broadcast %27 : vector<1x128xf32> to vector<8x128xf32>
    %29 = arith.addf %26, %28 : vector<8x128xf32>
    %cst_23 = arith.constant 0.00999999977 : f32
    %30 = vector.broadcast %cst_23 : f32 to vector<8x128xf32>
    %31 = arith.mulf %30, %29 : vector<8x128xf32>
    %32 = arith.maximumf %29, %31 : vector<8x128xf32>
    %c0_24 = arith.constant 0 : index
    %c0_25 = arith.constant 0 : index
    %33 = vector.load %arg10[%c0_24, %c0_25] : memref<128x128xf32, #tpu.memory_space<vmem>>, vector<128x128xf32>
    %cst_26 = arith.constant dense<0.000000e+00> : vector<8x128xf32>
    %34 = tpu.matmul %32, %33, %cst_26 {dimension_numbers = #tpu.dot_dimension_numbers<[1], [0], [0], [1], [0, 0, 1, 1], [], []>} : vector<8x128xf32>, vector<128x128xf32>, vector<8x128xf32> -> vector<8x128xf32>
    %c0_27 = arith.constant 0 : index
    %c0_28 = arith.constant 0 : index
    %35 = vector.load %arg11[%c0_27, %c0_28] : memref<1x128xf32, #tpu.memory_space<vmem>>, vector<1x128xf32>
    %36 = vector.broadcast %35 : vector<1x128xf32> to vector<8x128xf32>
    %37 = arith.addf %34, %36 : vector<8x128xf32>
    %c0_29 = arith.constant 0 : index
    %c0_30 = arith.constant 0 : index
    %38 = vector.load %arg12[%c0_29, %c0_30] : memref<8x128xf32, #tpu.memory_space<vmem>>, vector<8x128xf32>
    tpu.vector_store %arg12[%c0_29, %c0_30], %37 {strides = array<i32>} : memref<8x128xf32, #tpu.memory_space<vmem>>, vector<8x128xf32>,
    return
  }
  func.func @transform_0(%arg0: i32) -> (i32, i32) {
    %c0_i32 = arith.constant 0 : i32
    %c0_i32_0 = arith.constant 0 : i32
    return %arg0, %c0_i32 : i32, i32
  }
  func.func @transform_1(%arg0: i32) -> (i32, i32) {
    %c0_i32 = arith.constant 0 : i32
    %c0_i32_0 = arith.constant 0 : i32
    %c0_i32_1 = arith.constant 0 : i32
    return %c0_i32, %c0_i32_0 : i32, i32
  }
  func.func @transform_2(%arg0: i32) -> (i32, i32) {
    %c0_i32 = arith.constant 0 : i32
    %c0_i32_0 = arith.constant 0 : i32
    %c0_i32_1 = arith.constant 0 : i32
    return %c0_i32, %c0_i32_0 : i32, i32
  }
  func.func @transform_3(%arg0: i32) -> (i32, i32) {
    %c0_i32 = arith.constant 0 : i32
    %c0_i32_0 = arith.constant 0 : i32
    %c0_i32_1 = arith.constant 0 : i32
    return %c0_i32, %c0_i32_0 : i32, i32
  }
  func.func @transform_4(%arg0: i32) -> (i32, i32) {
    %c0_i32 = arith.constant 0 : i32
    %c0_i32_0 = arith.constant 0 : i32
    %c0_i32_1 = arith.constant 0 : i32
    return %c0_i32, %c0_i32_0 : i32, i32
  }
  func.func @transform_5(%arg0: i32) -> (i32, i32) {
    %c0_i32 = arith.constant 0 : i32
    %c0_i32_0 = arith.constant 0 : i32
    %c0_i32_1 = arith.constant 0 : i32
    return %c0_i32, %c0_i32_0 : i32, i32
  }
  func.func @transform_6(%arg0: i32) -> (i32, i32) {
    %c0_i32 = arith.constant 0 : i32
    %c0_i32_0 = arith.constant 0 : i32
    %c0_i32_1 = arith.constant 0 : i32
    return %c0_i32, %c0_i32_0 : i32, i32
  }
  func.func @transform_7(%arg0: i32) -> (i32, i32) {
    %c0_i32 = arith.constant 0 : i32
    %c0_i32_0 = arith.constant 0 : i32
    %c0_i32_1 = arith.constant 0 : i32
    return %c0_i32, %c0_i32_0 : i32, i32
  }
  func.func @transform_8(%arg0: i32) -> (i32, i32) {
    %c0_i32 = arith.constant 0 : i32
    %c0_i32_0 = arith.constant 0 : i32
    %c0_i32_1 = arith.constant 0 : i32
    return %c0_i32, %c0_i32_0 : i32, i32
  }
  func.func @transform_9(%arg0: i32) -> (i32, i32) {
    %c0_i32 = arith.constant 0 : i32
    %c0_i32_0 = arith.constant 0 : i32
    %c0_i32_1 = arith.constant 0 : i32
    return %c0_i32, %c0_i32_0 : i32, i32
  }
  func.func @transform_10(%arg0: i32) -> (i32, i32) {
    %c0_i32 = arith.constant 0 : i32
    %c0_i32_0 = arith.constant 0 : i32
    %c0_i32_1 = arith.constant 0 : i32
    return %c0_i32, %c0_i32_0 : i32, i32
  }
  func.func @transform_11(%arg0: i32) -> (i32, i32) {
    %c0_i32 = arith.constant 0 : i32
    %c0_i32_0 = arith.constant 0 : i32
    return %arg0, %c0_i32 : i32, i32
  }
}

</mosaic_0001>

<bundles_post_ra>
// kernel: fwd.1
= control target key start
LH: loop header
LB: loop body
LE: loop exit
PB: predicated region body
PF: predicated region fallthrough
CT: control target
= control target key end

     0   :  { %16 = vsyncpa [#allocation3], 0  ;;  %s1309_s0 = inlined_call_operand.vmem [shape: f32[8,256], index: 0, kind: input, shape index: {}]   ;;  %s1310_s1 = inlined_call_operand.hbm [shape: f32[256,256], index: 1, kind: input, shape index: {}]   ;;  %s1311_s2 = inlined_call_operand.vmem [shape: f32[1,256], index: 2, kind: input, shape index: {}]   ;;  %s1312_s3 = inlined_call_operand.hbm [shape: f32[256,256], index: 3, kind: input, shape index: {}]   ;;  %s1313_s4 = inlined_call_operand.vmem [shape: f32[1,256], index: 4, kind: input, shape index: {}]   ;;  %s1314_s5 = inlined_call_operand.hbm [shape: f32[256,640], index: 5, kind: input, shape index: {}]   ;;  %s1315_s6 = inlined_call_operand.vmem [shape: f32[1,640], index: 6, kind: input, shape index: {}]   ;;  %s1316_s7 = inlined_call_operand.hbm [shape: f32[640,128], index: 7, kind: input, shape index: {}]   ;;  %s1317_s8 = inlined_call_operand.vmem [shape: f32[1,128], index: 8, kind: input, shape index: {}]   ;;  %s1318_s9 = inlined_call_operand.vmem [shape: f32[128,128], index: 9, kind: input, shape index: {}]   ;;  %s1319_s10 = inlined_call_operand.vmem [shape: f32[1,128], index: 10, kind: input, shape index: {}]   ;;  %s1320_s11 = inlined_call_operand.vmem [shape: f32[8,128], index: 11, kind: output, shape index: {}]  }
   0x1   :  { %17 = vsyncpa [#allocation5], 0 }
   0x2   :  { %18 = vsyncpa [#allocation8], 0  ;;  %s40_s19 = sshll.u32 %s1312_s3, 4  ;;  %s1141_s20 = smov [#allocation4]   ;;  %s41_s19 = int_to_ptr.hbm [resolvable:$true] %s40_s19 }
   0x3   :  { %s42_s21 = sshll.u32 %s1141_s20, 4  ;;  %s25_s24 = sshll.u32 %s1310_s1, 4  ;;  %s43_s21 = int_to_ptr.vmem [resolvable:$true] %s42_s21  ;;  %s26_s24 = int_to_ptr.hbm [resolvable:$true] %s25_s24 }
   0x4   :  { %s1142_s25 = smov 256   ;;  %s1143_s26 = smov 16  }
   0x5   :  { %48 = dma.hbm_to_vmem [thread:$0]  %s41_s19, 8192, %s43_s21, [#allocation5], %s1142_s25, %s1142_s25, %s1143_s26  }
   0x6   :  { %s1144_s27 = smov [#allocation2]   ;;  %s55_s12 = sshll.u32 %s1314_s5, 4  ;;  %s56_s12 = int_to_ptr.hbm [resolvable:$true] %s55_s12 }
   0x7   :  { %s27_s28 = sshll.u32 %s1144_s27, 4  ;;  %s1145_s3 = smov [#allocation6]   ;;  %s28_s28 = int_to_ptr.vmem [resolvable:$true] %s27_s28 }
   0x8   :  { %33 = dma.hbm_to_vmem [thread:$0]  %s26_s24, 8192, %s28_s28, [#allocation3], %s1142_s25, %s1142_s25, %s1143_s26  }
   0x9   :  { %s57_s13 = sshll.u32 %s1145_s3, 4  ;;  %s70_s1 = sshll.u32 %s1316_s7, 4  ;;  %s58_s13 = int_to_ptr.vmem [resolvable:$true] %s57_s13  ;;  %s71_s1 = int_to_ptr.hbm [resolvable:$true] %s70_s1 }
   0xa   :  { %s1146_s16 = smov 640   ;;  %s1147_s17 = smov 40  }
   0xb   :  { %63 = dma.hbm_to_vmem [thread:$0]  %s56_s12, 20480, %s58_s13, [#allocation5], %s1146_s16, %s1146_s16, %s1147_s17  }
   0xc   :  { %s1148_s18 = smov [#allocation7]   ;;  %s1149_s20 = smov 128  }
   0xd   :  { %s72_s19 = sshll.u32 %s1148_s18, 4  ;;  %s1150_s21 = smov 8   ;;  %s73_s19 = int_to_ptr.vmem [resolvable:$true] %s72_s19 }
   0xe   :  { %78 = dma.hbm_to_vmem [thread:$0]  %s71_s1, 10240, %s73_s19, [#allocation8], %s1149_s20, %s1149_s20, %s1150_s21  }
   0xf   :  { %1135 = dma.done.wait [#allocation3], 8192  }
  0x10   :  { %1136 = vsyncadd [#allocation3], 4294959104 }
  0x11   :  { %1137 = dma.done.wait [#allocation5], 28672  }
  0x12   :  { %1138 = vsyncadd [#allocation5], 4294938624 }
  0x13   :  { %1139 = dma.done.wait [#allocation8], 10240  }
  0x14   :  { %1140 = vsyncadd [#allocation8], 4294957056  ;;  %v134_v0 = vld [vmem:[#allocation2 + $0xf8] sm:$0xff]  ;;  %v133_v1 = vld [vmem:[#allocation2 + $0xf0] sm:$0xff] }
  0x15   :  { %v132_v2 = vld [vmem:[#allocation2 + $0xe8] sm:$0xff]  ;;  %213 = vmatpush.msra.mxu2 %v134_v0  ;;  %173 = vmatpush.msra.mxu0 %v133_v1  ;;  %v166_v3 = vld [vmem:[#allocation2 + $0x1f8] sm:$0xff]  ;;  %v131_v4 = vld [vmem:[#allocation2 + $0xe0] sm:$0xff] }
  0x16   :  { %v165_v5 = vld [vmem:[#allocation2 + $0x1f0] sm:$0xff]  ;;  %233 = vmatpush.msra.mxu3 %v166_v3  ;;  %v130_v6 = vld [vmem:[#allocation2 + $0xd8] sm:$0xff]  ;;  %v164_v7 = vld [vmem:[#allocation2 + $0x1e8] sm:$0xff] }
  0x17   :  { %193 = vmatpush.msra.mxu1 %v165_v5  ;;  %v129_v8 = vld [vmem:[#allocation2 + $0xd0] sm:$0xff]  ;;  %214 = vmatpush.msra.mxu2 %v132_v2  ;;  %v163_v9 = vld [vmem:[#allocation2 + $0x1e0] sm:$0xff]  ;;  %v162_v10 = vld [vmem:[#allocation2 + $0x1d8] sm:$0xff] }
  0x18   :  { %174 = vmatpush.msra.mxu0 %v131_v4  ;;  %234 = vmatpush.msra.mxu3 %v164_v7  ;;  %v128_v11 = vld [vmem:[#allocation2 + $0xc8] sm:$0xff]  ;;  %v127_v12 = vld [vmem:[#allocation2 + $0xc0] sm:$0xff]  ;;  %v161_v13 = vld [vmem:[#allocation2 + $0x1d0] sm:$0xff] }
  0x19   :  { %194 = vmatpush.msra.mxu1 %v163_v9  ;;  %215 = vmatpush.msra.mxu2 %v130_v6  ;;  %v160_v14 = vld [vmem:[#allocation2 + $0x1c8] sm:$0xff]  ;;  %v159_v15 = vld [vmem:[#allocation2 + $0x1c0] sm:$0xff]  ;;  %v126_v16 = vld [vmem:[#allocation2 + $0xb8] sm:$0xff] }
  0x1a   :  { %175 = vmatpush.msra.mxu0 %v129_v8  ;;  %235 = vmatpush.msra.mxu3 %v162_v10  ;;  %v125_v17 = vld [vmem:[#allocation2 + $0xb0] sm:$0xff]  ;;  %v158_v18 = vld [vmem:[#allocation2 + $0x1b8] sm:$0xff]  ;;  %v124_v20 = vld [vmem:[#allocation2 + $0xa8] sm:$0xff] }
  0x1b   :  { %195 = vmatpush.msra.mxu1 %v161_v13  ;;  %216 = vmatpush.msra.mxu2 %v128_v11  ;;  %v157_v19 = vld [vmem:[#allocation2 + $0x1b0] sm:$0xff]  ;;  %v123_v21 = vld [vmem:[#allocation2 + $0xa0] sm:$0xff]  ;;  %v156_v22 = vld [vmem:[#allocation2 + $0x1a8] sm:$0xff] }
  0x1c   :  { %176 = vmatpush.msra.mxu0 %v127_v12  ;;  %236 = vmatpush.msra.mxu3 %v160_v14  ;;  %v155_v23 = vld [vmem:[#allocation2 + $0x1a0] sm:$0xff]  ;;  %v122_v24 = vld [vmem:[#allocation2 + $0x98] sm:$0xff]  ;;  %v121_v25 = vld [vmem:[#allocation2 + $0x90] sm:$0xff] }
  0x1d   :  { %196 = vmatpush.msra.mxu1 %v159_v15  ;;  %217 = vmatpush.msra.mxu2 %v126_v16  ;;  %v154_v26 = vld [vmem:[#allocation2 + $0x198] sm:$0xff]  ;;  %v153_v27 = vld [vmem:[#allocation2 + $0x190] sm:$0xff]  ;;  %v120_v28 = vld [vmem:[#allocation2 + $0x88] sm:$0xff] }
  0x1e   :  { %177 = vmatpush.msra.mxu0 %v125_v17  ;;  %237 = vmatpush.msra.mxu3 %v158_v18  ;;  %v119_v29 = vld [vmem:[#allocation2 + $0x80] sm:$0xff]  ;;  %v152_v30 = vld [vmem:[#allocation2 + $0x188] sm:$0xff]  ;;  %v118_v32 = vld [vmem:[#allocation2 + $0x78] sm:$0xff] }
  0x1f   :  { %197 = vmatpush.msra.mxu1 %v157_v19  ;;  %218 = vmatpush.msra.mxu2 %v124_v20  ;;  %v151_v31 = vld [vmem:[#allocation2 + $0x180] sm:$0xff]  ;;  %v117_v33 = vld [vmem:[#allocation2 + $0x70] sm:$0xff]  ;;  %v150_v34 = vld [vmem:[#allocation2 + $0x178] sm:$0xff] }
  0x20   :  { %178 = vmatpush.msra.mxu0 %v123_v21  ;;  %238 = vmatpush.msra.mxu3 %v156_v22  ;;  %v149_v35 = vld [vmem:[#allocation2 + $0x170] sm:$0xff]  ;;  %v116_v36 = vld [vmem:[#allocation2 + $0x68] sm:$0xff]  ;;  %v115_v37 = vld [vmem:[#allocation2 + $0x60] sm:$0xff] }
  0x21   :  { %198 = vmatpush.msra.mxu1 %v155_v23  ;;  %219 = vmatpush.msra.mxu2 %v122_v24  ;;  %v148_v38 = vld [vmem:[#allocation2 + $0x168] sm:$0xff]  ;;  %v147_v39 = vld [vmem:[#allocation2 + $0x160] sm:$0xff]  ;;  %v114_v40 = vld [vmem:[#allocation2 + $0x58] sm:$0xff] }
  0x22   :  { %179 = vmatpush.msra.mxu0 %v121_v25  ;;  %239 = vmatpush.msra.mxu3 %v154_v26  ;;  %v113_v41 = vld [vmem:[#allocation2 + $0x50] sm:$0xff]  ;;  %v146_v42 = vld [vmem:[#allocation2 + $0x158] sm:$0xff]  ;;  %v112_v44 = vld [vmem:[#allocation2 + $0x48] sm:$0xff] }
  0x23   :  { %199 = vmatpush.msra.mxu1 %v153_v27  ;;  %220 = vmatpush.msra.mxu2 %v120_v28  ;;  %v145_v43 = vld [vmem:[#allocation2 + $0x150] sm:$0xff]  ;;  %v111_v45 = vld [vmem:[#allocation2 + $0x40] sm:$0xff]  ;;  %v144_v46 = vld [vmem:[#allocation2 + $0x148] sm:$0xff] }
  0x24   :  { %180 = vmatpush.msra.mxu0 %v119_v29  ;;  %240 = vmatpush.msra.mxu3 %v152_v30  ;;  %v143_v47 = vld [vmem:[#allocation2 + $0x140] sm:$0xff]  ;;  %v110_v48 = vld [vmem:[#allocation2 + $0x38] sm:$0xff]  ;;  %v109_v49 = vld [vmem:[#allocation2 + $0x30] sm:$0xff] }
  0x25   :  { %200 = vmatpush.msra.mxu1 %v151_v31  ;;  %221 = vmatpush.msra.mxu2 %v118_v32  ;;  %v142_v50 = vld [vmem:[#allocation2 + $0x138] sm:$0xff]  ;;  %v141_v51 = vld [vmem:[#allocation2 + $0x130] sm:$0xff]  ;;  %v108_v52 = vld [vmem:[#allocation2 + $0x28] sm:$0xff] }
  0x26   :  { %181 = vmatpush.msra.mxu0 %v117_v33  ;;  %241 = vmatpush.msra.mxu3 %v150_v34  ;;  %v107_v53 = vld [vmem:[#allocation2 + $0x20] sm:$0xff]  ;;  %v140_v54 = vld [vmem:[#allocation2 + $0x128] sm:$0xff]  ;;  %v106_v56 = vld [vmem:[#allocation2 + $0x18] sm:$0xff] }
  0x27   :  { %201 = vmatpush.msra.mxu1 %v149_v35  ;;  %222 = vmatpush.msra.mxu2 %v116_v36  ;;  %v139_v55 = vld [vmem:[#allocation2 + $0x120] sm:$0xff]  ;;  %v105_v57 = vld [vmem:[#allocation2 + $0x10] sm:$0xff]  ;;  %v138_v58 = vld [vmem:[#allocation2 + $0x118] sm:$0xff] }
  0x28   :  { %182 = vmatpush.msra.mxu0 %v115_v37  ;;  %242 = vmatpush.msra.mxu3 %v148_v38  ;;  %v137_v59 = vld [vmem:[#allocation2 + $0x110] sm:$0xff]  ;;  %v104_v60 = vld [vmem:[#allocation2 + $0x8] sm:$0xff]  ;;  %v103_v61 = vld [vmem:[#allocation2] sm:$0xff] }
  0x29   :  { %202 = vmatpush.msra.mxu1 %v147_v39  ;;  %223 = vmatpush.msra.mxu2 %v114_v40  ;;  %v101_v62 = vld [vmem:[%s1309_s0] sm:$0xff]  ;;  %v136_v63 = vld [vmem:[#allocation2 + $0x108] sm:$0xff]  ;;  %v287_v2 = vld [vmem:[#allocation4 + $0xf0] sm:$0xff] }
  0x2a   :  { %183 = vmatpush.msra.mxu0 %v113_v41  ;;  %243 = vmatpush.msra.mxu3 %v146_v42  ;;  %v102_v0 = vld [vmem:[%s1309_s0 + $0x8] sm:$0xff]  ;;  %v135_v1 = vld [vmem:[#allocation2 + $0x100] sm:$0xff]  ;;  %v288_v3 = vld [vmem:[#allocation4 + $0xf8] sm:$0xff] }
  0x2b   :  { %203 = vmatpush.msra.mxu1 %v145_v43  ;;  %224 = vmatpush.msra.mxu2 %v112_v44  ;;  %v285_v4 = vld [vmem:[#allocation4 + $0xe0] sm:$0xff]  ;;  %v319_v5 = vld [vmem:[#allocation4 + $0x1f0] sm:$0xff]  ;;  %v286_v6 = vld [vmem:[#allocation4 + $0xe8] sm:$0xff] }
  0x2c   :  { %184 = vmatpush.msra.mxu0 %v111_v45  ;;  %244 = vmatpush.msra.mxu3 %v144_v46  ;;  %v320_v7 = vld [vmem:[#allocation4 + $0x1f8] sm:$0xff]  ;;  %v283_v8 = vld [vmem:[#allocation4 + $0xd0] sm:$0xff]  ;;  %v317_v9 = vld [vmem:[#allocation4 + $0x1e0] sm:$0xff] }
  0x2d   :  { %204 = vmatpush.msra.mxu1 %v143_v47  ;;  %225 = vmatpush.msra.mxu2 %v110_v48  ;;  %v284_v10 = vld [vmem:[#allocation4 + $0xd8] sm:$0xff]  ;;  %v318_v11 = vld [vmem:[#allocation4 + $0x1e8] sm:$0xff]  ;;  %v281_v12 = vld [vmem:[#allocation4 + $0xc0] sm:$0xff] }
  0x2e   :  { %185 = vmatpush.msra.mxu0 %v109_v49  ;;  %245 = vmatpush.msra.mxu3 %v142_v50  ;;  %v315_v13 = vld [vmem:[#allocation4 + $0x1d0] sm:$0xff]  ;;  %v282_v14 = vld [vmem:[#allocation4 + $0xc8] sm:$0xff]  ;;  %v316_v15 = vld [vmem:[#allocation4 + $0x1d8] sm:$0xff] }
  0x2f   :  { %205 = vmatpush.msra.mxu1 %v141_v51  ;;  %226 = vmatpush.msra.mxu2 %v108_v52  ;;  %v279_v16 = vld [vmem:[#allocation4 + $0xb0] sm:$0xff]  ;;  %v313_v17 = vld [vmem:[#allocation4 + $0x1c0] sm:$0xff]  ;;  %v280_v18 = vld [vmem:[#allocation4 + $0xb8] sm:$0xff] }
  0x30   :  { %186 = vmatpush.msra.mxu0 %v107_v53  ;;  %246 = vmatpush.msra.mxu3 %v140_v54  ;;  %v314_v19 = vld [vmem:[#allocation4 + $0x1c8] sm:$0xff]  ;;  %v277_v20 = vld [vmem:[#allocation4 + $0xa0] sm:$0xff]  ;;  %v311_v21 = vld [vmem:[#allocation4 + $0x1b0] sm:$0xff] }
  0x31   :  { %206 = vmatpush.msra.mxu1 %v139_v55  ;;  %227 = vmatpush.msra.mxu2 %v106_v56  ;;  %v278_v22 = vld [vmem:[#allocation4 + $0xa8] sm:$0xff]  ;;  %v312_v23 = vld [vmem:[#allocation4 + $0x1b8] sm:$0xff]  ;;  %v275_v24 = vld [vmem:[#allocation4 + $0x90] sm:$0xff] }
  0x32   :  { %187 = vmatpush.msra.mxu0 %v105_v57  ;;  %247 = vmatpush.msra.mxu3 %v138_v58  ;;  %v309_v25 = vld [vmem:[#allocation4 + $0x1a0] sm:$0xff]  ;;  %v276_v26 = vld [vmem:[#allocation4 + $0x98] sm:$0xff]  ;;  %v310_v27 = vld [vmem:[#allocation4 + $0x1a8] sm:$0xff] }
  0x33   :  { %207 = vmatpush.msra.mxu1 %v137_v59  ;;  %228 = vmatpush.msra.mxu2 %v104_v60  ;;  %v273_v28 = vld [vmem:[#allocation4 + $0x80] sm:$0xff]  ;;  %v307_v29 = vld [vmem:[#allocation4 + $0x190] sm:$0xff]  ;;  %v274_v30 = vld [vmem:[#allocation4 + $0x88] sm:$0xff] }
  0x34   :  { %188 = vmatpush.msra.mxu0 %v103_v61  ;;  %229 = vmatmul.f32.vlgmr.msra.gmra.mxu2 %v101_v62  ;;  %v308_v31 = vld [vmem:[#allocation4 + $0x198] sm:$0xff]  ;;  %v271_v32 = vld [vmem:[#allocation4 + $0x70] sm:$0xff]  ;;  %v305_v33 = vld [vmem:[#allocation4 + $0x180] sm:$0xff] }
  0x35   :  { %248 = vmatpush.msra.mxu3 %v136_v63  ;;  %189 = vmatmul.f32.vlgmr.msra.gmra.mxu0 %v101_v62  ;;  %v272_v34 = vld [vmem:[#allocation4 + $0x78] sm:$0xff]  ;;  %v306_v35 = vld [vmem:[#allocation4 + $0x188] sm:$0xff]  ;;  %v269_v36 = vld [vmem:[#allocation4 + $0x60] sm:$0xff] }
  0x36   :  { %249 = vmatmul.f32.vlgmr.msra.gmra.mxu3 %v102_v0  ;;  %208 = vmatpush.msra.mxu1 %v135_v1  ;;  %v303_v37 = vld [vmem:[#allocation4 + $0x170] sm:$0xff]  ;;  %v270_v38 = vld [vmem:[#allocation4 + $0x68] sm:$0xff]  ;;  %v304_v39 = vld [vmem:[#allocation4 + $0x178] sm:$0xff] }
  0x37   :  { %327 = vmatpush.msrb.mxu0 %v287_v2  ;;  %209 = vmatmul.f32.vlgmr.msra.gmra.mxu1 %v102_v0  ;;  %v267_v40 = vld [vmem:[#allocation4 + $0x50] sm:$0xff]  ;;  %v268_v41 = vld [vmem:[#allocation4 + $0x58] sm:$0xff]  ;;  %v265_v42 = vld [vmem:[#allocation4 + $0x40] sm:$0xff] }
  0x38   :  { %367 = vmatpush.msrb.mxu2 %v288_v3  ;;  %347 = vmatpush.msrb.mxu1 %v319_v5  ;;  %v301_v43 = vld [vmem:[#allocation4 + $0x160] sm:$0xff]  ;;  %v266_v44 = vld [vmem:[#allocation4 + $0x48] sm:$0xff]  ;;  %v263_v46 = vld [vmem:[#allocation4 + $0x30] sm:$0xff] }
  0x39   :  { %328 = vmatpush.msrb.mxu0 %v285_v4  ;;  %387 = vmatpush.msrb.mxu3 %v320_v7  ;;  %v302_v45 = vld [vmem:[#allocation4 + $0x168] sm:$0xff]  ;;  %v299_v47 = vld [vmem:[#allocation4 + $0x150] sm:$0xff]  ;;  %v264_v48 = vld [vmem:[#allocation4 + $0x38] sm:$0xff] }
  0x3a   :  { %368 = vmatpush.msrb.mxu2 %v286_v6  ;;  %348 = vmatpush.msrb.mxu1 %v317_v9  ;;  %v300_v49 = vld [vmem:[#allocation4 + $0x158] sm:$0xff]  ;;  %v261_v50 = vld [vmem:[#allocation4 + $0x20] sm:$0xff]  ;;  %v262_v52 = vld [vmem:[#allocation4 + $0x28] sm:$0xff] }
  0x3b   :  { %329 = vmatpush.msrb.mxu0 %v283_v8  ;;  %388 = vmatpush.msrb.mxu3 %v318_v11  ;;  %v297_v51 = vld [vmem:[#allocation4 + $0x140] sm:$0xff]  ;;  %v298_v53 = vld [vmem:[#allocation4 + $0x148] sm:$0xff]  ;;  %v259_v54 = vld [vmem:[#allocation4 + $0x10] sm:$0xff] }
  0x3c   :  { %369 = vmatpush.msrb.mxu2 %v284_v10  ;;  %349 = vmatpush.msrb.mxu1 %v315_v13  ;;  %v295_v55 = vld [vmem:[#allocation4 + $0x130] sm:$0xff]  ;;  %v260_v56 = vld [vmem:[#allocation4 + $0x18] sm:$0xff]  ;;  %v257_v58 = vld [vmem:[#allocation4] sm:$0xff] }
  0x3d   :  { %330 = vmatpush.msrb.mxu0 %v281_v12  ;;  %389 = vmatpush.msrb.mxu3 %v316_v15  ;;  %v296_v57 = vld [vmem:[#allocation4 + $0x138] sm:$0xff]  ;;  %v293_v59 = vld [vmem:[#allocation4 + $0x120] sm:$0xff]  ;;  %v258_v60 = vld [vmem:[#allocation4 + $0x8] sm:$0xff] }
  0x3e   :  { %370 = vmatpush.msrb.mxu2 %v282_v14  ;;  %350 = vmatpush.msrb.mxu1 %v313_v17  ;;  %v294_v61 = vld [vmem:[#allocation4 + $0x128] sm:$0xff]  ;;  %v291_v62 = vld [vmem:[#allocation4 + $0x110] sm:$0xff]  ;;  %v292_v63 = vld [vmem:[#allocation4 + $0x118] sm:$0xff] }
  0x3f   :  { %331 = vmatpush.msrb.mxu0 %v279_v16  ;;  %390 = vmatpush.msrb.mxu3 %v314_v19  ;;  %v289_v0 = vld [vmem:[#allocation4 + $0x100] sm:$0xff]  ;;  %v290_v1 = vld [vmem:[#allocation4 + $0x108] sm:$0xff]  ;;  %v486_v2 = vld [vmem:[#allocation6 + $0x258] sm:$0xff] }
  0x40   :  { %371 = vmatpush.msrb.mxu2 %v280_v18  ;;  %351 = vmatpush.msrb.mxu1 %v311_v21  ;;  %v481_v3 = vld [vmem:[#allocation6 + $0x230] sm:$0xff]  ;;  %v566_v4 = vld [vmem:[#allocation6 + $0x4d8] sm:$0xff]  ;;  %v476_v5 = vld [vmem:[#allocation6 + $0x208] sm:$0xff] }
  0x41   :  { %332 = vmatpush.msrb.mxu0 %v277_v20  ;;  %391 = vmatpush.msrb.mxu3 %v312_v23  ;;  %v561_v6 = vld [vmem:[#allocation6 + $0x4b0] sm:$0xff]  ;;  %v487_v7 = vld [vmem:[#allocation6 + $0x260] sm:$0xff]  ;;  %v556_v8 = vld [vmem:[#allocation6 + $0x488] sm:$0xff] }
  0x42   :  { %372 = vmatpush.msrb.mxu2 %v278_v22  ;;  %352 = vmatpush.msrb.mxu1 %v309_v25  ;;  %v482_v9 = vld [vmem:[#allocation6 + $0x238] sm:$0xff]  ;;  %v471_v10 = vld [vmem:[#allocation6 + $0x1e0] sm:$0xff]  ;;  %v477_v11 = vld [vmem:[#allocation6 + $0x210] sm:$0xff] }
  0x43   :  { %333 = vmatpush.msrb.mxu0 %v275_v24  ;;  %392 = vmatpush.msrb.mxu3 %v310_v27  ;;  %v551_v12 = vld [vmem:[#allocation6 + $0x460] sm:$0xff]  ;;  %v466_v14 = vld [vmem:[#allocation6 + $0x1b8] sm:$0xff]  ;;  %v472_v15 = vld [vmem:[#allocation6 + $0x1e8] sm:$0xff] }
  0x44   :  { %373 = vmatpush.msrb.mxu2 %v276_v26  ;;  %353 = vmatpush.msrb.mxu1 %v307_v29  ;;  %v567_v13 = vld [vmem:[#allocation6 + $0x4e0] sm:$0xff]  ;;  %v546_v16 = vld [vmem:[#allocation6 + $0x438] sm:$0xff]  ;;  %v461_v18 = vld [vmem:[#allocation6 + $0x190] sm:$0xff] }
  0x45   :  { %334 = vmatpush.msrb.mxu0 %v273_v28  ;;  %393 = vmatpush.msrb.mxu3 %v308_v31  ;;  %v562_v17 = vld [vmem:[#allocation6 + $0x4b8] sm:$0xff]  ;;  %v467_v19 = vld [vmem:[#allocation6 + $0x1c0] sm:$0xff]  ;;  %v557_v20 = vld [vmem:[#allocation6 + $0x490] sm:$0xff] }
  0x46   :  { %374 = vmatpush.msrb.mxu2 %v274_v30  ;;  %354 = vmatpush.msrb.mxu1 %v305_v33  ;;  %v541_v21 = vld [vmem:[#allocation6 + $0x410] sm:$0xff]  ;;  %v552_v22 = vld [vmem:[#allocation6 + $0x468] sm:$0xff]  ;;  %v462_v24 = vld [vmem:[#allocation6 + $0x198] sm:$0xff] }
  0x47   :  { %335 = vmatpush.msrb.mxu0 %v271_v32  ;;  %394 = vmatpush.msrb.mxu3 %v306_v35  ;;  %v456_v23 = vld [vmem:[#allocation6 + $0x168] sm:$0xff]  ;;  %v547_v26 = vld [vmem:[#allocation6 + $0x440] sm:$0xff]  ;;  %v457_v29 = vld [vmem:[#allocation6 + $0x170] sm:$0xff] }
  0x48   :  { %375 = vmatpush.msrb.mxu2 %v272_v34  ;;  %355 = vmatpush.msrb.mxu1 %v303_v37  ;;  %v536_v25 = vld [vmem:[#allocation6 + $0x3e8] sm:$0xff]  ;;  %v167_v27 = vld [vmem:[%s1311_s2] sm:$0x3]  ;;  %v542_v31 = vld [vmem:[#allocation6 + $0x418] sm:$0xff] }
  0x49   :  { %336 = vmatpush.msrb.mxu0 %v269_v36  ;;  %395 = vmatpush.msrb.mxu3 %v304_v39  ;;  %v451_v28 = vld [vmem:[#allocation6 + $0x140] sm:$0xff]  ;;  %v446_v32 = vld [vmem:[#allocation6 + $0x118] sm:$0xff]  ;;  %v452_v33 = vld [vmem:[#allocation6 + $0x148] sm:$0xff]  ;;  %v169_v34 = vperm.slane %v167_v27, 0 }
  0x4a   :  { %376 = vmatpush.msrb.mxu2 %v270_v38  ;;  %356 = vmatpush.msrb.mxu1 %v301_v43  ;;  %v531_v30 = vld [vmem:[#allocation6 + $0x3c0] sm:$0xff]  ;;  %v526_v35 = vld [vmem:[#allocation6 + $0x398] sm:$0xff]  ;;  %v537_v36 = vld [vmem:[#allocation6 + $0x3f0] sm:$0xff] }
  0x4b   :  { %337 = vmatpush.msrb.mxu0 %v267_v40  ;;  %396 = vmatpush.msrb.mxu3 %v302_v45  ;;  %v441_v37 = vld [vmem:[#allocation6 + $0xf0] sm:$0xff]  ;;  %v447_v38 = vld [vmem:[#allocation6 + $0x120] sm:$0xff]  ;;  %v532_v40 = vld [vmem:[#allocation6 + $0x3c8] sm:$0xff] }
  0x4c   :  { %377 = vmatpush.msrb.mxu2 %v268_v41  ;;  %357 = vmatpush.msrb.mxu1 %v299_v47  ;;  %v521_v39 = vld [vmem:[#allocation6 + $0x370] sm:$0xff]  ;;  %v442_v43 = vld [vmem:[#allocation6 + $0xf8] sm:$0xff]  ;;  %v516_v45 = vld [vmem:[#allocation6 + $0x348] sm:$0xff] }
  0x4d   :  { %338 = vmatpush.msrb.mxu0 %v265_v42  ;;  %397 = vmatpush.msrb.mxu3 %v300_v49  ;;  %v436_v42 = vld [vmem:[#allocation6 + $0xc8] sm:$0xff]  ;;  %v431_v49 = vld [vmem:[#allocation6 + $0xa0] sm:$0xff] }
  0x4e   :  { %378 = vmatpush.msrb.mxu2 %v266_v44  ;;  %358 = vmatpush.msrb.mxu1 %v297_v51 }
  0x4f   :  { %339 = vmatpush.msrb.mxu0 %v263_v46  ;;  %398 = vmatpush.msrb.mxu3 %v298_v53  ;;  %v527_v46 = vld [vmem:[#allocation6 + $0x3a0] sm:$0xff]  ;;  %v522_v53 = vld [vmem:[#allocation6 + $0x378] sm:$0xff] }
  0x50   :  { %379 = vmatpush.msrb.mxu2 %v264_v48  ;;  %359 = vmatpush.msrb.mxu1 %v295_v55  ;;  %v170_v48 = vperm.slane %v167_v27, 1  ;;  %v432_v55 = vld [vmem:[#allocation6 + $0xa8] sm:$0xff]  ;;  %v479_v27 = vld [vmem:[#allocation6 + $0x220] sm:$0xff] }
  0x51   :  { %340 = vmatpush.msrb.mxu0 %v261_v50  ;;  %399 = vmatpush.msrb.mxu3 %v296_v57  ;;  %v437_v50 = vld [vmem:[#allocation6 + $0xd0] sm:$0xff] }
  0x52   :  { %380 = vmatpush.msrb.mxu2 %v262_v52  ;;  %360 = vmatpush.msrb.mxu1 %v293_v59  ;;  %v511_v52 = vld [vmem:[#allocation6 + $0x320] sm:$0xff]  ;;  %v517_v59 = vld [vmem:[#allocation6 + $0x350] sm:$0xff] }
  0x53   :  { %341 = vmatpush.msrb.mxu0 %v259_v54  ;;  %400 = vmatpush.msrb.mxu3 %v294_v61  ;;  %v426_v54 = vld [vmem:[#allocation6 + $0x78] sm:$0xff] }
  0x54   :  { %381 = vmatpush.msrb.mxu2 %v260_v56  ;;  %361 = vmatpush.msrb.mxu1 %v291_v62 }
  0x55   :  { %342 = vmatpush.msrb.mxu0 %v257_v58  ;;  %401 = vmatpush.msrb.mxu3 %v292_v63  ;;  %v506_v58 = vld [vmem:[#allocation6 + $0x2f8] sm:$0xff]  ;;  %v421_v63 = vld [vmem:[#allocation6 + $0x50] sm:$0xff] }
  0x56   :  { %382 = vmatpush.msrb.mxu2 %v258_v60  ;;  %362 = vmatpush.msrb.mxu1 %v289_v0  ;;  %v501_v0 = vld [vmem:[#allocation6 + $0x2d0] sm:$0xff] }
  0x57   :  { %402 = vmatpush.msrb.mxu3 %v290_v1  ;;  %583 = vmatpush.msra.mxu0 %v486_v2  ;;  %v427_v2 = vld [vmem:[#allocation6 + $0x80] sm:$0xff] }
  0x58   :  { %603 = vmatpush.msra.mxu1 %v566_v4  ;;  %623 = vmatpush.msra.mxu2 %v487_v7  ;;  %v416_v4 = vld [vmem:[#allocation6 + $0x28] sm:$0xff]  ;;  %v422_v7 = vld [vmem:[#allocation6 + $0x58] sm:$0xff] }
  0x59   :  { %584 = vmatpush.msra.mxu0 %v481_v3  ;;  %643 = vmatpush.msra.mxu3 %v567_v13  ;;  %v512_v3 = vld [vmem:[#allocation6 + $0x328] sm:$0xff]  ;;  %v417_v13 = vld [vmem:[#allocation6 + $0x30] sm:$0xff] }
  0x5a   :  { %604 = vmatpush.msra.mxu1 %v561_v6  ;;  %624 = vmatpush.msra.mxu2 %v482_v9 }
  0x5b   :  { %585 = vmatpush.msra.mxu0 %v476_v5  ;;  %644 = vmatpush.msra.mxu3 %v562_v17  ;;  %v496_v5 = vld [vmem:[#allocation6 + $0x2a8] sm:$0xff] }
  0x5c   :  { %605 = vmatpush.msra.mxu1 %v556_v8  ;;  %625 = vmatpush.msra.mxu2 %v477_v11  ;;  %v507_v8 = vld [vmem:[#allocation6 + $0x300] sm:$0xff]  ;;  %v412_v17 = vld [vmem:[#allocation6 + $0x8] sm:$0xff] }
  0x5d   :  { %586 = vmatpush.msra.mxu0 %v471_v10  ;;  %645 = vmatpush.msra.mxu3 %v557_v20  ;;  %v411_v10 = vld [vmem:[#allocation6] sm:$0xff]  ;;  %v478_v20 = vld [vmem:[#allocation6 + $0x218] sm:$0xff] }
  0x5e   :  { %606 = vmatpush.msra.mxu1 %v551_v12  ;;  %626 = vmatpush.msra.mxu2 %v472_v15  ;;  %v491_v11 = vld [vmem:[#allocation6 + $0x280] sm:$0xff]  ;;  %v488_v12 = vld [vmem:[#allocation6 + $0x268] sm:$0xff]  ;;  %v502_v15 = vld [vmem:[#allocation6 + $0x2d8] sm:$0xff] }
  0x5f   :  { %587 = vmatpush.msra.mxu0 %v466_v14  ;;  %646 = vmatpush.msra.mxu3 %v552_v22  ;;  %v568_v14 = vld [vmem:[#allocation6 + $0x4e8] sm:$0xff]  ;;  %v558_v22 = vld [vmem:[#allocation6 + $0x498] sm:$0xff] }
  0x60   :  { %607 = vmatpush.msra.mxu1 %v546_v16  ;;  %627 = vmatpush.msra.mxu2 %v467_v19  ;;  %v483_v16 = vld [vmem:[#allocation6 + $0x240] sm:$0xff]  ;;  %v489_v19 = vld [vmem:[#allocation6 + $0x270] sm:$0xff] }
  0x61   :  { %588 = vmatpush.msra.mxu0 %v461_v18  ;;  %647 = vmatpush.msra.mxu3 %v547_v26  ;;  %v563_v18 = vld [vmem:[#allocation6 + $0x4c0] sm:$0xff]  ;;  %v553_v26 = vld [vmem:[#allocation6 + $0x470] sm:$0xff] }
  0x62   :  { %608 = vmatpush.msra.mxu1 %v541_v21  ;;  %628 = vmatpush.msra.mxu2 %v462_v24  ;;  %v497_v21 = vld [vmem:[#allocation6 + $0x2b0] sm:$0xff] }
  0x63   :  { %589 = vmatpush.msra.mxu0 %v456_v23  ;;  %648 = vmatpush.msra.mxu3 %v542_v31  ;;  %v484_v23 = vld [vmem:[#allocation6 + $0x248] sm:$0xff]  ;;  %v473_v24 = vld [vmem:[#allocation6 + $0x1f0] sm:$0xff]  ;;  %v474_v31 = vld [vmem:[#allocation6 + $0x1f8] sm:$0xff] }
  0x64   :  { %609 = vmatpush.msra.mxu1 %v536_v25  ;;  %629 = vmatpush.msra.mxu2 %v457_v29  ;;  %v492_v25 = vld [vmem:[#allocation6 + $0x288] sm:$0xff]  ;;  %v569_v29 = vld [vmem:[#allocation6 + $0x4f0] sm:$0xff] }
  0x65   :  { %590 = vmatpush.msra.mxu0 %v451_v28  ;;  %649 = vmatpush.msra.mxu3 %v537_v36  ;;  %v468_v28 = vld [vmem:[#allocation6 + $0x1c8] sm:$0xff]  ;;  %v458_v36 = vld [vmem:[#allocation6 + $0x178] sm:$0xff] }
  0x66   :  { %610 = vmatpush.msra.mxu1 %v531_v30  ;;  %630 = vmatpush.msra.mxu2 %v452_v33  ;;  %v548_v30 = vld [vmem:[#allocation6 + $0x448] sm:$0xff] }
  0x67   :  { %591 = vmatpush.msra.mxu0 %v446_v32  ;;  %650 = vmatpush.msra.mxu3 %v532_v40  ;;  %v463_v32 = vld [vmem:[#allocation6 + $0x1a0] sm:$0xff]  ;;  %v564_v33 = vld [vmem:[#allocation6 + $0x4c8] sm:$0xff]  ;;  %v453_v40 = vld [vmem:[#allocation6 + $0x150] sm:$0xff] }
  0x68   :  { %611 = vmatpush.msra.mxu1 %v526_v35  ;;  %631 = vmatpush.msra.mxu2 %v447_v38  ;;  %v469_v35 = vld [vmem:[#allocation6 + $0x1d0] sm:$0xff]  ;;  %v538_v38 = vld [vmem:[#allocation6 + $0x3f8] sm:$0xff] }
  0x69   :  { %592 = vmatpush.msra.mxu0 %v441_v37  ;;  %651 = vmatpush.msra.mxu3 %v527_v46  ;;  %v559_v37 = vld [vmem:[#allocation6 + $0x4a0] sm:$0xff]  ;;  %v554_v46 = vld [vmem:[#allocation6 + $0x478] sm:$0xff] }
  0x6a   :  { %612 = vmatpush.msra.mxu1 %v521_v39  ;;  %632 = vmatpush.msra.mxu2 %v442_v43  ;;  %v464_v39 = vld [vmem:[#allocation6 + $0x1a8] sm:$0xff]  ;;  %v438_v43 = vld [vmem:[#allocation6 + $0xd8] sm:$0xff] }
  0x6b   :  { %593 = vmatpush.msra.mxu0 %v436_v42  ;;  %652 = vmatpush.msra.mxu3 %v522_v53  ;;  %v443_v42 = vld [vmem:[#allocation6 + $0x100] sm:$0xff]  ;;  %v449_v53 = vld [vmem:[#allocation6 + $0x130] sm:$0xff] }
  0x6c   :  { %613 = vmatpush.msra.mxu1 %v516_v45  ;;  %633 = vmatpush.msra.mxu2 %v437_v50  ;;  %v459_v45 = vld [vmem:[#allocation6 + $0x180] sm:$0xff]  ;;  %v549_v50 = vld [vmem:[#allocation6 + $0x450] sm:$0xff] }
  0x6d   :  { %594 = vmatpush.msra.mxu0 %v431_v49  ;;  %653 = vmatpush.msra.mxu3 %v517_v59  ;;  %v454_v49 = vld [vmem:[#allocation6 + $0x158] sm:$0xff] }
  0x6e   :  { %614 = vmatpush.msra.mxu1 %v511_v52  ;;  %634 = vmatpush.msra.mxu2 %v432_v55  ;;  %v523_v52 = vld [vmem:[#allocation6 + $0x380] sm:$0xff]  ;;  %v418_v59 = vld [vmem:[#allocation6 + $0x38] sm:$0xff] }
  0x6f   :  { %595 = vmatpush.msra.mxu0 %v426_v54  ;;  %654 = vmatpush.msra.mxu3 %v512_v3  ;;  %v544_v54 = vld [vmem:[#allocation6 + $0x428] sm:$0xff]  ;;  %v423_v55 = vld [vmem:[#allocation6 + $0x60] sm:$0xff] }
  0x70   :  { %615 = vmatpush.msra.mxu1 %v506_v58  ;;  %635 = vmatpush.msra.mxu2 %v427_v2  ;;  %v539_v58 = vld [vmem:[#allocation6 + $0x400] sm:$0xff]  ;;  %v529_v2 = vld [vmem:[#allocation6 + $0x3b0] sm:$0xff] }
  0x71   :  { %596 = vmatpush.msra.mxu0 %v421_v63  ;;  %655 = vmatpush.msra.mxu3 %v507_v8  ;;  %v413_v63 = vld [vmem:[#allocation6 + $0x10] sm:$0xff]  ;;  %v503_v3 = vld [vmem:[#allocation6 + $0x2e0] sm:$0xff] }
  0x72   :  { %616 = vmatpush.msra.mxu1 %v501_v0  ;;  %636 = vmatpush.msra.mxu2 %v422_v7  ;;  %v508_v0 = vld [vmem:[#allocation6 + $0x308] sm:$0xff]  ;;  %v519_v8 = vld [vmem:[#allocation6 + $0x360] sm:$0xff] }
  0x73   :  { %597 = vmatpush.msra.mxu0 %v416_v4  ;;  %656 = vmatpush.msra.mxu3 %v502_v15  ;;  %v429_v4 = vld [vmem:[#allocation6 + $0x90] sm:$0xff]  ;;  %v424_v7 = vld [vmem:[#allocation6 + $0x68] sm:$0xff]  ;;  %v499_v15 = vld [vmem:[#allocation6 + $0x2c0] sm:$0xff] }
  0x74   :  { %617 = vmatpush.msra.mxu1 %v496_v5  ;;  %637 = vmatpush.msra.mxu2 %v417_v13  ;;  %v524_v5 = vld [vmem:[#allocation6 + $0x388] sm:$0xff]  ;;  %v509_v13 = vld [vmem:[#allocation6 + $0x310] sm:$0xff] }
  0x75   :  { %598 = vmatpush.msra.mxu0 %v411_v10  ;;  %657 = vmatpush.msra.mxu3 %v497_v21  ;;  %v419_v10 = vld [vmem:[#allocation6 + $0x40] sm:$0xff] }
  0x76   :  { %618 = vmatpush.msra.mxu1 %v491_v11  ;;  %638 = vmatpush.msra.mxu2 %v412_v17  ;;  %v514_v11 = vld [vmem:[#allocation6 + $0x338] sm:$0xff]  ;;  %v321_v17 = vld [vmem:[%s1313_s4] sm:$0x3] }
  0x77   :  { %658 = vmatpush.msra.mxu3 %v492_v25 }
  0xb2   :  { %v190_v41 = vpop.f32.mrf.mxu0 }
  0xb3   :  { %v191_v44 = vadd.f32 %v190_v41, %v169_v34  ;;  %v543_v34 = vld [vmem:[#allocation6 + $0x420] sm:$0xff]  ;;  %v448_v41 = vld [vmem:[#allocation6 + $0x128] sm:$0xff] }
  0xb4   :  { %v210_v47 = vpop.f32.mrf.mxu1 }
  0xb5   :  { %v211_v51 = vadd.f32 %v210_v47, %v191_v44  ;;  %v533_v44 = vld [vmem:[#allocation6 + $0x3d0] sm:$0xff] }
  0xb6   :  { %v433_v47 = vld [vmem:[#allocation6 + $0xb0] sm:$0xff] }
  0xb7   :  { %v253_v56 = vmul.f32 0.01, %v211_v51  ;;  %v230_v57 = vpop.f32.mrf.mxu2 }
  0xb8   :  { %v231_v60 = vadd.f32 %v230_v57, %v170_v48  ;;  %v528_v48 = vld [vmem:[#allocation6 + $0x3a8] sm:$0xff] }
  0xb9   :  { %v250_v61 = vpop.f32.mrf.mxu3  ;;  %v255_v62 = vmax.f32 %v211_v51, %v253_v56  ;;  %v428_v51 = vld [vmem:[#allocation6 + $0x88] sm:$0xff]  ;;  %v518_v56 = vld [vmem:[#allocation6 + $0x358] sm:$0xff] }
  0xba   :  { %v251_v1 = vadd.f32 %v250_v61, %v231_v60  ;;  %v444_v57 = vld [vmem:[#allocation6 + $0x108] sm:$0xff]  ;;  %v513_v60 = vld [vmem:[#allocation6 + $0x330] sm:$0xff]  ;;  %v439_v61 = vld [vmem:[#allocation6 + $0xe0] sm:$0xff] }
  0xbb   :  { %343 = vmatmul.f32.vlgmr.msrb.gmra.mxu0 %v255_v62  ;;  %383 = vmatmul.f32.vlgmr.msrb.gmra.mxu2 %v255_v62  ;;  %v534_v62 = vld [vmem:[#allocation6 + $0x3d8] sm:$0xff] }
  0xbc   :  { %v254_v6 = vmul.f32 0.01, %v251_v1  ;;  %663 = vmatpush.msrb.mxu0 %v488_v12  ;;  %703 = vmatpush.msrb.mxu2 %v489_v19  ;;  %v414_v12 = vld [vmem:[#allocation6 + $0x18] sm:$0xff] }
  0xbe   :  { %v256_v9 = vmax.f32 %v251_v1, %v254_v6  ;;  %664 = vmatpush.msrb.mxu0 %v483_v16  ;;  %704 = vmatpush.msrb.mxu2 %v484_v23  ;;  %v434_v1 = vld [vmem:[#allocation6 + $0xb8] sm:$0xff]  ;;  %v324_v23 = vperm.slane %v321_v17, 1 }
  0xbf   :  { %v498_v6 = vld [vmem:[#allocation6 + $0x2b8] sm:$0xff] }
  0xc0   :  { %363 = vmatmul.f32.vlgmr.msrb.gmra.mxu1 %v256_v9  ;;  %403 = vmatmul.f32.vlgmr.msrb.gmra.mxu3 %v256_v9  ;;  %v493_v9 = vld [vmem:[#allocation6 + $0x290] sm:$0xff]  ;;  %v494_v16 = vld [vmem:[#allocation6 + $0x298] sm:$0xff] }
  0xc1   :  { %683 = vmatpush.msrb.mxu1 %v568_v14  ;;  %665 = vmatpush.msrb.mxu0 %v478_v20  ;;  %v504_v14 = vld [vmem:[#allocation6 + $0x2e8] sm:$0xff] }
  0xc2   :  { %705 = vmatpush.msrb.mxu2 %v479_v27  ;;  %723 = vmatpush.msrb.mxu3 %v569_v29 }
  0xc3   :  { %684 = vmatpush.msrb.mxu1 %v563_v18  ;;  %666 = vmatpush.msrb.mxu0 %v473_v24  ;;  %v323_v18 = vperm.slane %v321_v17, 0  ;;  %v838_v17 = vld [vmem:[#allocation7 + $0x168] sm:$0xff] }
  0xc4   :  { %706 = vmatpush.msrb.mxu2 %v474_v31  ;;  %724 = vmatpush.msrb.mxu3 %v564_v33  ;;  %v485_v31 = vld [vmem:[#allocation6 + $0x250] sm:$0xff]  ;;  %v480_v33 = vld [vmem:[#allocation6 + $0x228] sm:$0xff] }
  0xc5   :  { %685 = vmatpush.msrb.mxu1 %v558_v22  ;;  %667 = vmatpush.msrb.mxu0 %v468_v28  ;;  %v490_v28 = vld [vmem:[#allocation6 + $0x278] sm:$0xff] }
  0xc6   :  { %707 = vmatpush.msrb.mxu2 %v469_v35  ;;  %725 = vmatpush.msrb.mxu3 %v559_v37  ;;  %v475_v35 = vld [vmem:[#allocation6 + $0x200] sm:$0xff]  ;;  %v470_v37 = vld [vmem:[#allocation6 + $0x1d8] sm:$0xff] }
  0xc7   :  { %686 = vmatpush.msrb.mxu1 %v553_v26  ;;  %668 = vmatpush.msrb.mxu0 %v463_v32 }
  0xc8   :  { %708 = vmatpush.msrb.mxu2 %v464_v39  ;;  %726 = vmatpush.msrb.mxu3 %v554_v46  ;;  %v808_v39 = vld [vmem:[#allocation7 + $0x78] sm:$0xff]  ;;  %v555_v46 = vld [vmem:[#allocation6 + $0x480] sm:$0xff] }
  0xc9   :  { %687 = vmatpush.msrb.mxu1 %v548_v30  ;;  %669 = vmatpush.msrb.mxu0 %v458_v36  ;;  %v570_v36 = vld [vmem:[#allocation6 + $0x4f8] sm:$0xff] }
  0xca   :  { %709 = vmatpush.msrb.mxu2 %v459_v45  ;;  %727 = vmatpush.msrb.mxu3 %v549_v50  ;;  %v460_v45 = vld [vmem:[#allocation6 + $0x188] sm:$0xff] }
  0xcb   :  { %688 = vmatpush.msrb.mxu1 %v543_v34  ;;  %670 = vmatpush.msrb.mxu0 %v453_v40  ;;  %v824_v40 = vld [vmem:[#allocation7 + $0xf8] sm:$0xff]  ;;  %v822_v50 = vld [vmem:[#allocation7 + $0xe8] sm:$0xff] }
  0xcc   :  { %710 = vmatpush.msrb.mxu2 %v454_v49  ;;  %728 = vmatpush.msrb.mxu3 %v544_v54  ;;  %v806_v49 = vld [vmem:[#allocation7 + $0x68] sm:$0xff]  ;;  %v821_v54 = vld [vmem:[#allocation7 + $0xe0] sm:$0xff] }
  0xcd   :  { %689 = vmatpush.msrb.mxu1 %v538_v38  ;;  %671 = vmatpush.msrb.mxu0 %v448_v41  ;;  %v565_v38 = vld [vmem:[#allocation6 + $0x4d0] sm:$0xff] }
  0xce   :  { %711 = vmatpush.msrb.mxu2 %v449_v53  ;;  %729 = vmatpush.msrb.mxu3 %v539_v58  ;;  %v465_v41 = vld [vmem:[#allocation6 + $0x1b0] sm:$0xff]  ;;  %v805_v53 = vld [vmem:[#allocation7 + $0x60] sm:$0xff]  ;;  %v820_v58 = vld [vmem:[#allocation7 + $0xd8] sm:$0xff] }
  0xcf   :  { %672 = vmatpush.msrb.mxu0 %v443_v42  ;;  %690 = vmatpush.msrb.mxu1 %v533_v44  ;;  %v560_v42 = vld [vmem:[#allocation6 + $0x4a8] sm:$0xff]  ;;  %v823_v44 = vld [vmem:[#allocation7 + $0xf0] sm:$0xff] }
  0xd0   :  { %712 = vmatpush.msrb.mxu2 %v444_v57  ;;  %730 = vmatpush.msrb.mxu3 %v534_v62  ;;  %v804_v57 = vld [vmem:[#allocation7 + $0x58] sm:$0xff]  ;;  %v819_v62 = vld [vmem:[#allocation7 + $0xd0] sm:$0xff] }
  0xd1   :  { %673 = vmatpush.msrb.mxu0 %v438_v43  ;;  %691 = vmatpush.msrb.mxu1 %v528_v48  ;;  %v807_v43 = vld [vmem:[#allocation7 + $0x70] sm:$0xff]  ;;  %v550_v48 = vld [vmem:[#allocation6 + $0x458] sm:$0xff] }
  0xd2   :  { %713 = vmatpush.msrb.mxu2 %v439_v61  ;;  %731 = vmatpush.msrb.mxu3 %v529_v2  ;;  %v803_v61 = vld [vmem:[#allocation7 + $0x50] sm:$0xff]  ;;  %v430_v2 = vld [vmem:[#allocation6 + $0x98] sm:$0xff] }
  0xd3   :  { %674 = vmatpush.msrb.mxu0 %v433_v47  ;;  %692 = vmatpush.msrb.mxu1 %v523_v52  ;;  %v455_v47 = vld [vmem:[#allocation6 + $0x160] sm:$0xff]  ;;  %v545_v52 = vld [vmem:[#allocation6 + $0x430] sm:$0xff] }
  0xd4   :  { %714 = vmatpush.msrb.mxu2 %v434_v1  ;;  %732 = vmatpush.msrb.mxu3 %v524_v5  ;;  %v802_v1 = vld [vmem:[#allocation7 + $0x48] sm:$0xff]  ;;  %v425_v5 = vld [vmem:[#allocation6 + $0x70] sm:$0xff] }
  0xd5   :  { %675 = vmatpush.msrb.mxu0 %v428_v51  ;;  %693 = vmatpush.msrb.mxu1 %v518_v56  ;;  %v450_v51 = vld [vmem:[#allocation6 + $0x138] sm:$0xff]  ;;  %v540_v56 = vld [vmem:[#allocation6 + $0x408] sm:$0xff] }
  0xd6   :  { %715 = vmatpush.msrb.mxu2 %v429_v4  ;;  %733 = vmatpush.msrb.mxu3 %v519_v8  ;;  %v801_v4 = vld [vmem:[#allocation7 + $0x40] sm:$0xff]  ;;  %v420_v8 = vld [vmem:[#allocation6 + $0x48] sm:$0xff] }
  0xd7   :  { %676 = vmatpush.msrb.mxu0 %v423_v55  ;;  %694 = vmatpush.msrb.mxu1 %v513_v60  ;;  %v445_v55 = vld [vmem:[#allocation6 + $0x110] sm:$0xff]  ;;  %v535_v60 = vld [vmem:[#allocation6 + $0x3e0] sm:$0xff] }
  0xd8   :  { %716 = vmatpush.msrb.mxu2 %v424_v7  ;;  %734 = vmatpush.msrb.mxu3 %v514_v11  ;;  %v800_v7 = vld [vmem:[#allocation7 + $0x38] sm:$0xff] }
  0xd9   :  { %677 = vmatpush.msrb.mxu0 %v418_v59  ;;  %695 = vmatpush.msrb.mxu1 %v508_v0  ;;  %v440_v59 = vld [vmem:[#allocation6 + $0xe8] sm:$0xff]  ;;  %v530_v0 = vld [vmem:[#allocation6 + $0x3b8] sm:$0xff] }
  0xda   :  { %717 = vmatpush.msrb.mxu2 %v419_v10  ;;  %735 = vmatpush.msrb.mxu3 %v509_v13  ;;  %v415_v10 = vld [vmem:[#allocation6 + $0x20] sm:$0xff]  ;;  %v510_v11 = vld [vmem:[#allocation6 + $0x318] sm:$0xff] }
  0xdb   :  { %678 = vmatpush.msrb.mxu0 %v413_v63  ;;  %696 = vmatpush.msrb.mxu1 %v503_v3  ;;  %v435_v63 = vld [vmem:[#allocation6 + $0xc0] sm:$0xff]  ;;  %v525_v3 = vld [vmem:[#allocation6 + $0x390] sm:$0xff]  ;;  %v840_v13 = vld [vmem:[#allocation7 + $0x178] sm:$0xff] }
  0xdc   :  { %718 = vmatpush.msrb.mxu2 %v414_v12  ;;  %736 = vmatpush.msrb.mxu3 %v504_v14  ;;  %v505_v12 = vld [vmem:[#allocation6 + $0x2f0] sm:$0xff]  ;;  %v500_v14 = vld [vmem:[#allocation6 + $0x2c8] sm:$0xff] }
  0xdd   :  { %697 = vmatpush.msrb.mxu1 %v498_v6  ;;  %v520_v6 = vld [vmem:[#allocation6 + $0x368] sm:$0xff] }
  0xde   :  { %737 = vmatpush.msrb.mxu3 %v499_v15  ;;  %v839_v15 = vld [vmem:[#allocation7 + $0x170] sm:$0xff] }
  0xdf   :  { %698 = vmatpush.msrb.mxu1 %v493_v9  ;;  %v515_v9 = vld [vmem:[#allocation6 + $0x340] sm:$0xff] }
  0xe0   :  { %738 = vmatpush.msrb.mxu3 %v494_v16  ;;  %v495_v16 = vld [vmem:[#allocation6 + $0x2a0] sm:$0xff] }
 0x138   :  { %v344_v19 = vpop.f32.mrf.mxu0 }
 0x139   :  { %v345_v20 = vadd.f32 %v344_v19, %v323_v18  ;;  %v837_v18 = vld [vmem:[#allocation7 + $0x160] sm:$0xff]  ;;  %v856_v19 = vld [vmem:[#allocation7 + $0x1f8] sm:$0xff] }
 0x13d   :  { %v364_v21 = vpop.f32.mrf.mxu1 }
 0x13e   :  { %v365_v22 = vadd.f32 %v364_v21, %v345_v20  ;;  %v384_v24 = vpop.f32.mrf.mxu2  ;;  %v836_v20 = vld [vmem:[#allocation7 + $0x158] sm:$0xff]  ;;  %v855_v21 = vld [vmem:[#allocation7 + $0x1f0] sm:$0xff] }
 0x13f   :  { %v385_v27 = vadd.f32 %v384_v24, %v324_v23  ;;  %v818_v23 = vld [vmem:[#allocation7 + $0xc8] sm:$0xff]  ;;  %v835_v24 = vld [vmem:[#allocation7 + $0x150] sm:$0xff] }
 0x140   :  { %v407_v25 = vmul.f32 0.01, %v365_v22 }
 0x142   :  { %v1235_v26 = vmax.f32 %v365_v22, %v407_v25  ;;  %v799_v22 = vld [vmem:[#allocation7 + $0x30] sm:$0xff]  ;;  %v854_v25 = vld [vmem:[#allocation7 + $0x1e8] sm:$0xff] }
 0x143   :  { %v404_v29 = vpop.f32.mrf.mxu3 }
 0x144   :  { %v405_v30 = vadd.f32 %v404_v29, %v385_v27  ;;  %599 = vmatmul.f32.vlgmr.msra.gmra.mxu0 %v1235_v26  ;;  %639 = vmatmul.f32.vlgmr.msra.gmra.mxu2 %v1235_v26  ;;  %v817_v27 = vld [vmem:[#allocation7 + $0xc0] sm:$0xff] }
 0x145   :  { %743 = vmatpush.msra.mxu0 %v490_v28  ;;  %877 = vmatpush.msra.mxu2 %v808_v39  ;;  %v834_v28 = vld [vmem:[#allocation7 + $0x148] sm:$0xff]  ;;  %v853_v29 = vld [vmem:[#allocation7 + $0x1e0] sm:$0xff] }
 0x146   :  { %v408_v32 = vmul.f32 0.01, %v405_v30  ;;  %v814_v39 = vld [vmem:[#allocation7 + $0xa8] sm:$0xff] }
 0x147   :  { %744 = vmatpush.msra.mxu0 %v485_v31  ;;  %878 = vmatpush.msra.mxu2 %v807_v43  ;;  %v816_v31 = vld [vmem:[#allocation7 + $0xb8] sm:$0xff]  ;;  %v813_v43 = vld [vmem:[#allocation7 + $0xa0] sm:$0xff] }
 0x148   :  { %v1239_v34 = vmax.f32 %v405_v30, %v408_v32  ;;  %v797_v30 = vld [vmem:[#allocation7 + $0x20] sm:$0xff] }
 0x149   :  { %745 = vmatpush.msra.mxu0 %v480_v33  ;;  %879 = vmatpush.msra.mxu2 %v806_v49  ;;  %v833_v32 = vld [vmem:[#allocation7 + $0x140] sm:$0xff]  ;;  %v852_v33 = vld [vmem:[#allocation7 + $0x1d8] sm:$0xff] }
 0x14a   :  { %619 = vmatmul.f32.vlgmr.msra.gmra.mxu1 %v1239_v34  ;;  %659 = vmatmul.f32.vlgmr.msra.gmra.mxu3 %v1239_v34  ;;  %v848_v49 = vld [vmem:[#allocation7 + $0x1b8] sm:$0xff] }
 0x14b   :  { %746 = vmatpush.msra.mxu0 %v475_v35  ;;  %763 = vmatpush.msra.mxu1 %v570_v36  ;;  %v815_v35 = vld [vmem:[#allocation7 + $0xb0] sm:$0xff]  ;;  %v832_v36 = vld [vmem:[#allocation7 + $0x138] sm:$0xff] }
 0x14c   :  { %679 = vmatmul.f32.vlgmr.msrb.gmra.mxu0 %v1235_v26  ;;  %719 = vmatmul.f32.vlgmr.msrb.gmra.mxu2 %v1235_v26 }
 0x14d   :  { %747 = vmatpush.msra.mxu0 %v470_v37  ;;  %764 = vmatpush.msra.mxu1 %v565_v38  ;;  %v851_v37 = vld [vmem:[#allocation7 + $0x1d0] sm:$0xff] }
 0x14e   :  { %897 = vmatpush.msra.mxu3 %v824_v40  ;;  %880 = vmatpush.msra.mxu2 %v805_v53  ;;  %v795_v38 = vld [vmem:[#allocation7 + $0x10] sm:$0xff] }
 0x14f   :  { %748 = vmatpush.msra.mxu0 %v465_v41  ;;  %765 = vmatpush.msra.mxu1 %v560_v42  ;;  %v831_v40 = vld [vmem:[#allocation7 + $0x130] sm:$0xff]  ;;  %v850_v41 = vld [vmem:[#allocation7 + $0x1c8] sm:$0xff] }
 0x150   :  { %898 = vmatpush.msra.mxu3 %v823_v44  ;;  %881 = vmatpush.msra.mxu2 %v804_v57  ;;  %v794_v42 = vld [vmem:[#allocation7 + $0x8] sm:$0xff]  ;;  %v847_v53 = vld [vmem:[#allocation7 + $0x1b0] sm:$0xff] }
 0x151   :  { %749 = vmatpush.msra.mxu0 %v460_v45  ;;  %766 = vmatpush.msra.mxu1 %v555_v46  ;;  %v830_v44 = vld [vmem:[#allocation7 + $0x128] sm:$0xff]  ;;  %v849_v45 = vld [vmem:[#allocation7 + $0x1c0] sm:$0xff] }
 0x152   :  { %699 = vmatmul.f32.vlgmr.msrb.gmra.mxu1 %v1239_v34  ;;  %739 = vmatmul.f32.vlgmr.msrb.gmra.mxu3 %v1239_v34  ;;  %v793_v46 = vld [vmem:[#allocation7] sm:$0xff]  ;;  %v846_v57 = vld [vmem:[#allocation7 + $0x1a8] sm:$0xff] }
 0x153   :  { %750 = vmatpush.msra.mxu0 %v455_v47  ;;  %767 = vmatpush.msra.mxu1 %v550_v48  ;;  %v812_v47 = vld [vmem:[#allocation7 + $0x98] sm:$0xff]  ;;  %v829_v48 = vld [vmem:[#allocation7 + $0x120] sm:$0xff] }
 0x154   :  { %899 = vmatpush.msra.mxu3 %v822_v50  ;;  %882 = vmatpush.msra.mxu2 %v803_v61  ;;  %v872_v50 = vld [vmem:[#allocation7 + $0x278] sm:$0xff]  ;;  %v845_v61 = vld [vmem:[#allocation7 + $0x1a0] sm:$0xff] }
 0x155   :  { %751 = vmatpush.msra.mxu0 %v450_v51  ;;  %768 = vmatpush.msra.mxu1 %v545_v52  ;;  %v811_v51 = vld [vmem:[#allocation7 + $0x90] sm:$0xff]  ;;  %v828_v52 = vld [vmem:[#allocation7 + $0x118] sm:$0xff] }
 0x156   :  { %900 = vmatpush.msra.mxu3 %v821_v54  ;;  %883 = vmatpush.msra.mxu2 %v802_v1  ;;  %v871_v54 = vld [vmem:[#allocation7 + $0x270] sm:$0xff]  ;;  %v868_v1 = vld [vmem:[#allocation7 + $0x258] sm:$0xff] }
 0x157   :  { %752 = vmatpush.msra.mxu0 %v445_v55  ;;  %769 = vmatpush.msra.mxu1 %v540_v56  ;;  %v810_v55 = vld [vmem:[#allocation7 + $0x88] sm:$0xff]  ;;  %v827_v56 = vld [vmem:[#allocation7 + $0x110] sm:$0xff] }
 0x158   :  { %901 = vmatpush.msra.mxu3 %v820_v58  ;;  %884 = vmatpush.msra.mxu2 %v801_v4  ;;  %v870_v58 = vld [vmem:[#allocation7 + $0x268] sm:$0xff] }
 0x159   :  { %753 = vmatpush.msra.mxu0 %v440_v59  ;;  %770 = vmatpush.msra.mxu1 %v535_v60  ;;  %v809_v59 = vld [vmem:[#allocation7 + $0x80] sm:$0xff]  ;;  %v826_v60 = vld [vmem:[#allocation7 + $0x108] sm:$0xff] }
 0x15a   :  { %902 = vmatpush.msra.mxu3 %v819_v62  ;;  %885 = vmatpush.msra.mxu2 %v800_v7  ;;  %v869_v62 = vld [vmem:[#allocation7 + $0x260] sm:$0xff]  ;;  %v842_v4 = vld [vmem:[#allocation7 + $0x188] sm:$0xff] }
 0x15b   :  { %754 = vmatpush.msra.mxu0 %v435_v63  ;;  %771 = vmatpush.msra.mxu1 %v530_v0  ;;  %v825_v63 = vld [vmem:[#allocation7 + $0x100] sm:$0xff]  ;;  %v844_v0 = vld [vmem:[#allocation7 + $0x198] sm:$0xff] }
 0x15c   :  { %886 = vmatpush.msra.mxu2 %v799_v22  ;;  %903 = vmatpush.msra.mxu3 %v818_v23  ;;  %v865_v7 = vld [vmem:[#allocation7 + $0x240] sm:$0xff] }
 0x15d   :  { %755 = vmatpush.msra.mxu0 %v430_v2  ;;  %772 = vmatpush.msra.mxu1 %v525_v3  ;;  %v843_v2 = vld [vmem:[#allocation7 + $0x190] sm:$0xff] }
 0x15e   :  { %904 = vmatpush.msra.mxu3 %v817_v27  ;;  %v867_v3 = vld [vmem:[#allocation7 + $0x250] sm:$0xff] }
 0x15f   :  { %756 = vmatpush.msra.mxu0 %v425_v5  ;;  %773 = vmatpush.msra.mxu1 %v520_v6  ;;  %v866_v5 = vld [vmem:[#allocation7 + $0x248] sm:$0xff]  ;;  %v841_v6 = vld [vmem:[#allocation7 + $0x180] sm:$0xff] }
 0x160   :  { %905 = vmatpush.msra.mxu3 %v816_v31 }
 0x161   :  { %757 = vmatpush.msra.mxu0 %v420_v8  ;;  %774 = vmatpush.msra.mxu1 %v515_v9  ;;  %v864_v8 = vld [vmem:[#allocation7 + $0x238] sm:$0xff]  ;;  %v571_v9 = vld [vmem:[%s1315_s6] sm:$0x1f] }
 0x162   :  { %906 = vmatpush.msra.mxu3 %v815_v35  ;;  %v575_v23 = vperm.slane %v571_v9, 2  ;;  %v576_v35 = vperm.slane %v571_v9, 3 }
 0x163   :  { %758 = vmatpush.msra.mxu0 %v415_v10  ;;  %775 = vmatpush.msra.mxu1 %v510_v11  ;;  %v863_v10 = vld [vmem:[#allocation7 + $0x230] sm:$0xff] }
 0x164   :  { %759 = vmatmul.f32.vlgmr.msra.gmra.mxu0 %v1235_v26  ;;  %v798_v26 = vld [vmem:[#allocation7 + $0x28] sm:$0xff]  ;;  %907 = vmatpush.msra.mxu3 %v814_v39 }
 0x165   :  { %776 = vmatpush.msra.mxu1 %v505_v12  ;;  %917 = vmatpush.msrb.mxu0 %v840_v13  ;;  %v573_v12 = vperm.slane %v571_v9, 0  ;;  %v862_v13 = vld [vmem:[#allocation7 + $0x228] sm:$0xff] }
 0x166   :  { %887 = vmatpush.msra.mxu2 %v798_v26  ;;  %908 = vmatpush.msra.mxu3 %v813_v43 }
 0x167   :  { %777 = vmatpush.msra.mxu1 %v500_v14  ;;  %918 = vmatpush.msrb.mxu0 %v839_v15  ;;  %v861_v14 = vld [vmem:[#allocation7 + $0x220] sm:$0xff] }
 0x168   :  { %888 = vmatpush.msra.mxu2 %v797_v30  ;;  %909 = vmatpush.msra.mxu3 %v812_v47 }
 0x169   :  { %778 = vmatpush.msra.mxu1 %v495_v16  ;;  %919 = vmatpush.msrb.mxu0 %v838_v17  ;;  %v860_v16 = vld [vmem:[#allocation7 + $0x218] sm:$0xff] }
 0x16a   :  { %779 = vmatmul.f32.vlgmr.msra.gmra.mxu1 %v1239_v34  ;;  %v796_v34 = vld [vmem:[#allocation7 + $0x18] sm:$0xff]  ;;  %910 = vmatpush.msra.mxu3 %v811_v51 }
 0x16b   :  { %920 = vmatpush.msrb.mxu0 %v837_v18  ;;  %937 = vmatpush.msrb.mxu1 %v856_v19 }
 0x16c   :  { %889 = vmatpush.msra.mxu2 %v796_v34  ;;  %911 = vmatpush.msra.mxu3 %v810_v55  ;;  %v991_v55 = vld [vmem:[%s1318_s9 + $0x60] sm:$0xff] }
 0x16d   :  { %921 = vmatpush.msrb.mxu0 %v836_v20  ;;  %938 = vmatpush.msrb.mxu1 %v855_v21  ;;  %v574_v20 = vperm.slane %v571_v9, 1  ;;  %v859_v21 = vld [vmem:[#allocation7 + $0x210] sm:$0xff] }
 0x16e   :  { %890 = vmatpush.msra.mxu2 %v795_v38  ;;  %912 = vmatpush.msra.mxu3 %v809_v59  ;;  %v987_v59 = vld [vmem:[%s1318_s9 + $0x40] sm:$0xff] }
 0x16f   :  { %922 = vmatpush.msrb.mxu0 %v835_v24  ;;  %939 = vmatpush.msrb.mxu1 %v854_v25  ;;  %v858_v24 = vld [vmem:[#allocation7 + $0x208] sm:$0xff] }
 0x170   :  { %891 = vmatpush.msra.mxu2 %v794_v42 }
 0x171   :  { %923 = vmatpush.msrb.mxu0 %v834_v28  ;;  %940 = vmatpush.msrb.mxu1 %v853_v29  ;;  %v857_v28 = vld [vmem:[#allocation7 + $0x200] sm:$0xff] }
 0x172   :  { %892 = vmatpush.msra.mxu2 %v793_v46 }
 0x173   :  { %924 = vmatpush.msrb.mxu0 %v833_v32  ;;  %941 = vmatpush.msrb.mxu1 %v852_v33 }
 0x174   :  { %957 = vmatpush.msrb.mxu2 %v872_v50 }
 0x175   :  { %925 = vmatpush.msrb.mxu0 %v832_v36  ;;  %942 = vmatpush.msrb.mxu1 %v851_v37 }
 0x176   :  { %958 = vmatpush.msrb.mxu2 %v871_v54  ;;  %v992_v54 = vld [vmem:[%s1318_s9 + $0x68] sm:$0xff] }
 0x177   :  { %926 = vmatpush.msrb.mxu0 %v831_v40  ;;  %943 = vmatpush.msrb.mxu1 %v850_v41 }
 0x178   :  { %959 = vmatpush.msrb.mxu2 %v870_v58  ;;  %v988_v58 = vld [vmem:[%s1318_s9 + $0x48] sm:$0xff] }
 0x179   :  { %927 = vmatpush.msrb.mxu0 %v830_v44  ;;  %944 = vmatpush.msrb.mxu1 %v849_v45  ;;  %v577_v45 = vperm.slane %v571_v9, 4 }
 0x17a   :  { %960 = vmatpush.msrb.mxu2 %v869_v62  ;;  %v984_v62 = vld [vmem:[%s1318_s9 + $0x28] sm:$0xff] }
 0x17b   :  { %928 = vmatpush.msrb.mxu0 %v829_v48  ;;  %945 = vmatpush.msrb.mxu1 %v848_v49 }
 0x17c   :  { %961 = vmatpush.msrb.mxu2 %v868_v1  ;;  %v981_v1 = vld [vmem:[%s1318_s9 + $0x10] sm:$0xff] }
 0x17d   :  { %929 = vmatpush.msrb.mxu0 %v828_v52  ;;  %946 = vmatpush.msrb.mxu1 %v847_v53  ;;  %v994_v52 = vld [vmem:[%s1318_s9 + $0x78] sm:$0xff]  ;;  %v993_v53 = vld [vmem:[%s1318_s9 + $0x70] sm:$0xff] }
 0x17e   :  { %962 = vmatpush.msrb.mxu2 %v867_v3  ;;  %999 = vmatpush.msrb.mxu3 %v994_v52  ;;  %v979_v3 = vld [vmem:[%s1318_s9] sm:$0xff] }
 0x17f   :  { %930 = vmatpush.msrb.mxu0 %v827_v56  ;;  %947 = vmatpush.msrb.mxu1 %v846_v57  ;;  %v990_v56 = vld [vmem:[%s1318_s9 + $0x58] sm:$0xff]  ;;  %v989_v57 = vld [vmem:[%s1318_s9 + $0x50] sm:$0xff] }
 0x180   :  { %963 = vmatpush.msrb.mxu2 %v866_v5  ;;  %1000 = vmatpush.msrb.mxu3 %v993_v53 }
 0x181   :  { %931 = vmatpush.msrb.mxu0 %v826_v60  ;;  %948 = vmatpush.msrb.mxu1 %v845_v61  ;;  %v986_v60 = vld [vmem:[%s1318_s9 + $0x38] sm:$0xff]  ;;  %v985_v61 = vld [vmem:[%s1318_s9 + $0x30] sm:$0xff] }
 0x182   :  { %964 = vmatpush.msrb.mxu2 %v865_v7  ;;  %1001 = vmatpush.msrb.mxu3 %v992_v54 }
 0x183   :  { %932 = vmatpush.msrb.mxu0 %v825_v63  ;;  %949 = vmatpush.msrb.mxu1 %v844_v0  ;;  %v983_v63 = vld [vmem:[%s1318_s9 + $0x20] sm:$0xff]  ;;  %v982_v0 = vld [vmem:[%s1318_s9 + $0x18] sm:$0xff] }
 0x184   :  { %965 = vmatpush.msrb.mxu2 %v864_v8  ;;  %1002 = vmatpush.msrb.mxu3 %v991_v55 }
 0x185   :  { %950 = vmatpush.msrb.mxu1 %v843_v2  ;;  %v980_v2 = vld [vmem:[%s1318_s9 + $0x8] sm:$0xff] }
 0x186   :  { %966 = vmatpush.msrb.mxu2 %v863_v10  ;;  %1003 = vmatpush.msrb.mxu3 %v990_v56 }
 0x187   :  { %951 = vmatpush.msrb.mxu1 %v842_v4  ;;  %v1037_v4 = vld [vmem:[%s1317_s8] ss:$0 sm:$0xff] }
 0x188   :  { %967 = vmatpush.msrb.mxu2 %v862_v13  ;;  %1004 = vmatpush.msrb.mxu3 %v989_v57 }
 0x189   :  { %952 = vmatpush.msrb.mxu1 %v841_v6 }
 0x18a   :  { %968 = vmatpush.msrb.mxu2 %v861_v14  ;;  %1005 = vmatpush.msrb.mxu3 %v988_v58 }
 0x18c   :  { %969 = vmatpush.msrb.mxu2 %v860_v16  ;;  %1006 = vmatpush.msrb.mxu3 %v987_v59 }
 0x18e   :  { %970 = vmatpush.msrb.mxu2 %v859_v21  ;;  %1007 = vmatpush.msrb.mxu3 %v986_v60 }
 0x190   :  { %971 = vmatpush.msrb.mxu2 %v858_v24  ;;  %1008 = vmatpush.msrb.mxu3 %v985_v61 }
 0x192   :  { %972 = vmatpush.msrb.mxu2 %v857_v28  ;;  %1009 = vmatpush.msrb.mxu3 %v984_v62 }
 0x194   :  { %1010 = vmatpush.msrb.mxu3 %v983_v63 }
 0x196   :  { %1011 = vmatpush.msrb.mxu3 %v982_v0 }
 0x198   :  { %1012 = vmatpush.msrb.mxu3 %v981_v1 }
 0x19a   :  { %1013 = vmatpush.msrb.mxu3 %v980_v2 }
 0x19c   :  { %1014 = vmatpush.msrb.mxu3 %v979_v3 }
 0x1c1   :  { %v600_v11 = vpop.f32.mrf.mxu0 }
 0x1c2   :  { %v601_v15 = vadd.f32 %v600_v11, %v573_v12 }
 0x1c7   :  { %v620_v17 = vpop.f32.mrf.mxu1  ;;  %v640_v18 = vpop.f32.mrf.mxu2 }
 0x1c8   :  { %v621_v19 = vadd.f32 %v620_v17, %v601_v15  ;;  %v641_v27 = vadd.f32 %v640_v18, %v574_v20  ;;  %v1038_v17 = vld [vmem:[%s1319_s10] ss:$0 sm:$0xff] }
 0x1c9   :  { %v680_v25 = vpop.f32.mrf.mxu0 }
 0x1ca   :  { %v783_v22 = vmul.f32 0.01, %v621_v19  ;;  %v681_v30 = vadd.f32 %v680_v25, %v575_v23 }
 0x1cc   :  { %v788_v26 = vmax.f32 %v621_v19, %v783_v22 }
 0x1cd   :  { %v660_v29 = vpop.f32.mrf.mxu3 }
 0x1ce   :  { %v661_v31 = vadd.f32 %v660_v29, %v641_v27  ;;  %893 = vmatmul.f32.vlgmr.msra.gmra.mxu2 %v788_v26 }
 0x1cf   :  { %v700_v32 = vpop.f32.mrf.mxu1  ;;  %v720_v36 = vpop.f32.mrf.mxu2 }
 0x1d0   :  { %v784_v33 = vmul.f32 0.01, %v661_v31  ;;  %v701_v34 = vadd.f32 %v700_v32, %v681_v30  ;;  %v721_v40 = vadd.f32 %v720_v36, %v576_v35 }
 0x1d2   :  { %v789_v37 = vmax.f32 %v661_v31, %v784_v33  ;;  %v785_v38 = vmul.f32 0.01, %v701_v34 }
 0x1d4   :  { %v790_v39 = vmax.f32 %v701_v34, %v785_v38  ;;  %913 = vmatmul.f32.vlgmr.msra.gmra.mxu3 %v789_v37 }
 0x1d5   :  { %v740_v41 = vpop.f32.mrf.mxu3 }
 0x1d6   :  { %v741_v42 = vadd.f32 %v740_v41, %v721_v40  ;;  %933 = vmatmul.f32.vlgmr.msrb.gmra.mxu0 %v790_v39 }
 0x1d8   :  { %v786_v43 = vmul.f32 0.01, %v741_v42 }
 0x1da   :  { %v791_v44 = vmax.f32 %v741_v42, %v786_v43 }
 0x1dc   :  { %953 = vmatmul.f32.vlgmr.msrb.gmra.mxu1 %v791_v44 }
 0x1e1   :  { %v760_v46 = vpop.f32.mrf.mxu0 }
 0x1e2   :  { %v761_v47 = vadd.f32 %v760_v46, %v577_v45 }
 0x1e7   :  { %v780_v48 = vpop.f32.mrf.mxu1 }
 0x1e8   :  { %v781_v49 = vadd.f32 %v780_v48, %v761_v47 }
 0x1ea   :  { %v787_v50 = vmul.f32 0.01, %v781_v49 }
 0x1ec   :  { %v792_v51 = vmax.f32 %v781_v49, %v787_v50 }
 0x1ee   :  { %973 = vmatmul.f32.vlgmr.msrb.gmra.mxu2 %v792_v51 }
 0x251   :  { %v894_v5 = vpop.f32.mrf.mxu2 }
 0x252   :  { %v895_v7 = vadd.f32 %v1037_v4, %v894_v5 }
 0x253   :  { %v934_v9 = vpop.f32.mrf.mxu0 }
 0x257   :  { %v914_v6 = vpop.f32.mrf.mxu3 }
 0x258   :  { %v915_v8 = vadd.f32 %v914_v6, %v895_v7 }
 0x259   :  { %v954_v11 = vpop.f32.mrf.mxu1 }
 0x25a   :  { %v935_v10 = vadd.f32 %v934_v9, %v915_v8 }
 0x25c   :  { %v955_v12 = vadd.f32 %v954_v11, %v935_v10 }
 0x271   :  { %v974_v13 = vpop.f32.mrf.mxu2 }
 0x272   :  { %v975_v14 = vadd.f32 %v974_v13, %v955_v12 }
 0x274   :  { %v977_v15 = vmul.f32 0.01, %v975_v14 }
 0x276   :  { %v978_v16 = vmax.f32 %v975_v14, %v977_v15 }
 0x278   :  { %1015 = vmatmul.f32.vlgmr.msrb.gmra.mxu3 %v978_v16 }
 0x2fb   :  { %v1016_v18 = vpop.f32.mrf.mxu3 }
 0x2fc   :  { %v1017_v19 = vadd.f32 %v1038_v17, %v1016_v18 }
 0x2fe   :  { %1019 = vst [vmem:[%s1320_s11] sm:$0xff] %v1017_v19 }
 0x2ff   :  { %1024 = vsyncpa [#allocation3], 1 }
 0x300   :  { %1025 = vsyncpa [#allocation5], 1 }
 0x301   :  { %1026 = vsyncpa [#allocation8], 1 }

</bundles_post_ra>
